<compile_context>
chip_gen: v7x
topology: tpu7x:2x2x1
jax: 0.10.0
libtpu: 0.0.40
codegen_flags: <defaults>
</compile_context>

<pallas_src>
import functools

import jax
import jax.numpy as jnp
from jax.experimental import pallas as pl
from jax.experimental.pallas import tpu as pltpu

EPS = 1e-5          # torch.nn.BatchNorm1d default eps
SUB = 256           # rows per in-kernel sub-chunk (multiple of 128)
MAX_TILE = 2048     # max rows per grid step


def _round_up(n, m):
    return ((n + m - 1) // m) * m


def _cdiv(n, m):
    return (n + m - 1) // m


def _make_kernel(n_sub, sub):
    """Fused forward kernel for one (n_sub*sub)-row batch tile."""

    def kernel(x_ref,                               # (TB, F) f32
               w1_ref, w2_ref, w3_ref,              # encoder weights (bf16)
               w4_ref, w5_ref, w6_ref,              # dense weights, BN folded (bf16)
               w7t_ref,                             # final weight, transposed (1, 32) bf16
               bias_ref,                            # (8, 128) f32: row r = bias of layer r
               o_ref):                              # (n_sub, sub) f32 (lane-dense)

        def linear(h, w_ref, row, width):
            b = bias_ref[row:row + 1, :width]                        # (1, width) f32
            return jnp.dot(h, w_ref[...],
                           preferred_element_type=jnp.float32) + b   # (sub, width) f32

        def body(s, carry):
            r0 = pl.multiple_of(s * sub, sub)
            # f32 -> bf16 cast done here (in-kernel), not in the wrapper.
            x = x_ref[pl.ds(r0, sub), :].astype(jnp.bfloat16)        # (sub, F)

            # ----- encoder: Linear->Tanh x3 (tanh in f32, bf16 feed to MXU) ---
            # (A/B candidate: drop the bf16 casts and feed f32 activations;
            #  these dots are latency-bound, K,N <= 64.)
            h = jnp.tanh(linear(x, w1_ref, 0, 32)).astype(jnp.bfloat16)
            h = jnp.tanh(linear(h, w2_ref, 1, 16)).astype(jnp.bfloat16)
            h = jnp.tanh(linear(h, w3_ref, 2, 12)).astype(jnp.bfloat16)

            # ----- dense_nn: Linear(+folded BN)->ReLU (Dropout identity) ------
            d = jnp.maximum(linear(h, w4_ref, 3, 32), 0.0).astype(jnp.bfloat16)
            d = jnp.maximum(linear(d, w5_ref, 4, 64), 0.0).astype(jnp.bfloat16)
            d = jnp.maximum(linear(d, w6_ref, 5, 32), 0.0).astype(jnp.bfloat16)

            # ----- final Linear(32->1)+Sigmoid, computed transposed so the
            #       store is a lane-dense (1, sub) row, not a (sub, 1) column --
            logit_t = jax.lax.dot_general(
                w7t_ref[...], d,
                dimension_numbers=(((1,), (1,)), ((), ())),
                preferred_element_type=jnp.float32)                  # (1, sub)
            logit_t = logit_t + bias_ref[6:7, :1]
            o_ref[pl.ds(s, 1), :] = jax.nn.sigmoid(logit_t).astype(o_ref.dtype)
            return carry

        jax.lax.fori_loop(0, n_sub, body, 0,
                          unroll=2 if n_sub >= 2 else 1)

    return kernel


def make_params(num_features, key):
    """Deterministic parameter init mimicking torch's default Linear init shapes."""
    dims = [
        (num_features, 32),  # encoder L1
        (32, 16),            # encoder L2
        (16, 12),            # encoder L3
        (12, 32),            # dense L1
        (32, 64),            # dense L2
        (64, 32),            # dense L3
        (32, 1),             # dense L4
    ]
    params = {}
    keys = jax.random.split(key, 2 * len(dims) + 12)
    ki = 0
    ws, bs = [], []
    for (fin, fout) in dims:
        bound = 1.0 / jnp.sqrt(fin)
        w = jax.random.uniform(keys[ki], (fin, fout), jnp.float32, -bound, bound)
        ki += 1
        b = jax.random.uniform(keys[ki], (1, fout), jnp.float32, -bound, bound)
        ki += 1
        ws.append(w)
        bs.append(b)
    params["w"], params["b"] = ws, bs

    # BatchNorm1d params for the three BN layers (sizes 32, 64, 32).
    bn = []
    for size in (32, 64, 32):
        gamma = 1.0 + 0.01 * jax.random.normal(keys[ki], (1, size), jnp.float32); ki += 1
        beta = 0.01 * jax.random.normal(keys[ki], (1, size), jnp.float32); ki += 1
        mean = 0.05 * jax.random.normal(keys[ki], (1, size), jnp.float32); ki += 1
        var = 1.0 + 0.1 * jax.random.uniform(keys[ki], (1, size), jnp.float32); ki += 1
        bn.append((gamma, beta, mean, var))
    params["bn"] = bn
    return params


def fold_and_pack(params):
    """One-time host-side prep: fold eval-mode BatchNorm into the preceding
    Linear, pack the 7 biases into one (8,128) f32 buffer, pre-transpose the
    final weight, cast weights to bf16. Call ONCE at load time."""
    w, b, bn = params["w"], params["b"], params["bn"]
    ws = [w[0], w[1], w[2]]
    bs = [b[0], b[1], b[2]]
    for i, (gamma, beta, mean, var) in enumerate(bn):
        scale = gamma * jax.lax.rsqrt(var + EPS)          # (1, size)
        ws.append(w[3 + i] * scale)                       # scale output columns
        bs.append((b[3 + i] - mean) * scale + beta)
    ws.append(w[6])
    bs.append(b[6])

    bias_pack = jnp.zeros((8, 128), jnp.float32)
    for r, bias in enumerate(bs):
        bias_pack = bias_pack.at[r, :bias.shape[1]].set(bias[0])

    kernel_ws = [wi.astype(jnp.bfloat16) for wi in ws[:6]]
    kernel_ws.append(ws[6].T.astype(jnp.bfloat16))        # (1, 32) transposed final W
    return tuple(kernel_ws), bias_pack


@functools.partial(jax.jit, static_argnames=("tile_batch", "sub"))
def autoencoder_forward(x, kernel_ws, bias_pack, *, tile_batch=None, sub=SUB):
    N, F = x.shape
    if sub % 128 != 0:
        raise ValueError("sub must be a multiple of 128 (lane-dense output)")

    if tile_batch is not None:
        if tile_batch <= 0 or tile_batch % sub != 0:
            raise ValueError(f"tile_batch must be a positive multiple of {sub}")
        TB = tile_batch
    else:
        n_sub_total = _cdiv(max(N, 1), sub)
        # Cap the tile so the grid keeps >=2 steps when there is enough work:
        # with dimension_semantics=("parallel",) that shards across v7x's 2 TCs.
        tb_cap = max(1, n_sub_total // 2) * sub
        TB = max(sub, min(MAX_TILE, tb_cap))

    n_sub = TB // sub
    N_pad = _round_up(max(N, 1), TB)
    if N_pad != N:
        # TODO(synk): ragged batch handled by a single pad; for a serving hot
        # path, round the batch size outside this function instead.
        x = jnp.pad(x, ((0, N_pad - N), (0, 0)))
    num_tiles = N_pad // TB

    # x stays f32 all the way into the kernel (cast happens per sub-chunk).
    in_specs = [pl.BlockSpec((TB, F), lambda i: (i, 0))]          # x: row-tiled
    for w in kernel_ws:                                           # params: VMEM-resident
        in_specs.append(pl.BlockSpec(w.shape, lambda i: (0, 0)))
    in_specs.append(pl.BlockSpec(bias_pack.shape, lambda i: (0, 0)))

    out = pl.pallas_call(
        _make_kernel(n_sub, sub),
        out_shape=jax.ShapeDtypeStruct((num_tiles, n_sub, sub), jnp.float32),
        grid=(num_tiles,),
        in_specs=in_specs,
        out_specs=pl.BlockSpec((None, n_sub, sub), lambda i: (i, 0, 0)),
        compiler_params=pltpu.CompilerParams(
            dimension_semantics=("parallel",),
            vmem_limit_bytes=32 * 1024 * 1024),
    )(x, *kernel_ws, bias_pack)

    return out.reshape(N_pad)[:N].reshape(N, 1)


def reference_forward(x, params):
    """Pure-JAX f32 reference (unfused BN, eval mode) for sanity checking."""
    w, b, bn = params["w"], params["b"], params["bn"]
    h = jnp.tanh(x @ w[0] + b[0])
    h = jnp.tanh(h @ w[1] + b[1])
    enc = jnp.tanh(h @ w[2] + b[2])

    def bn_relu(d, p):
        g, be, m, v = p
        return jnp.maximum((d - m) / jnp.sqrt(v + EPS) * g + be, 0.0)

    d = bn_relu(enc @ w[3] + b[3], bn[0])
    d = bn_relu(d @ w[4] + b[4], bn[1])
    d = bn_relu(d @ w[5] + b[5], bn[2])
    return jax.nn.sigmoid(d @ w[6] + b[6])


if __name__ == "__main__":
    key = jax.random.PRNGKey(0)
    k_x, k_p = jax.random.split(key)

    batch = 8
    num_features = 32  # stand-in for X_train.shape[1]

    x = jax.random.normal(k_x, (batch, num_features), jnp.float32)
    params = make_params(num_features, k_p)

    # Host-side parameter prep happens once at load time, not per forward call.
    kernel_ws, bias_pack = fold_and_pack(params)

    out = autoencoder_forward(x, kernel_ws, bias_pack)
    out = jax.block_until_ready(out)

    ref = reference_forward(x, params)
    assert out.shape == (batch, 1), out.shape
    # bf16 weights/activations in the kernel vs f32 reference -> loose tolerance.
    assert jnp.allclose(out, ref, atol=2e-2, rtol=2e-2), (out, ref)

    print("KERNEL_OK")
</pallas_src>

<mosaic_0001>
module attributes {stable_mosaic.version = 11 : i64} {
  func.func @kernel(%arg0: i32, %arg1: memref<256x32xf32, #tpu.memory_space<vmem>>, %arg2: memref<32x32xbf16, #tpu.memory_space<vmem>>, %arg3: memref<32x16xbf16, #tpu.memory_space<vmem>>, %arg4: memref<16x12xbf16, #tpu.memory_space<vmem>>, %arg5: memref<12x32xbf16, #tpu.memory_space<vmem>>, %arg6: memref<32x64xbf16, #tpu.memory_space<vmem>>, %arg7: memref<64x32xbf16, #tpu.memory_space<vmem>>, %arg8: memref<1x32xbf16, #tpu.memory_space<vmem>>, %arg9: memref<8x128xf32, #tpu.memory_space<vmem>>, %arg10: memref<1x1x256xf32, #tpu.memory_space<vmem>>) attributes {dimension_semantics = [#tpu.dimension_semantics<parallel>], iteration_bounds = array<i64: 1>, scalar_prefetch = 0 : i64, scratch_operands = 0 : i64, tpu.core_type = #tpu.core_type<tc>, window_params = [{transform_indices = @transform_0, window_bounds = array<i64: 256, 32>}, {pipeline_mode = #tpu.pipeline_mode<synchronous>, transform_indices = @transform_1, window_bounds = array<i64: 32, 32>}, {pipeline_mode = #tpu.pipeline_mode<synchronous>, transform_indices = @transform_2, window_bounds = array<i64: 32, 16>}, {pipeline_mode = #tpu.pipeline_mode<synchronous>, transform_indices = @transform_3, window_bounds = array<i64: 16, 12>}, {pipeline_mode = #tpu.pipeline_mode<synchronous>, transform_indices = @transform_4, window_bounds = array<i64: 12, 32>}, {pipeline_mode = #tpu.pipeline_mode<synchronous>, transform_indices = @transform_5, window_bounds = array<i64: 32, 64>}, {pipeline_mode = #tpu.pipeline_mode<synchronous>, transform_indices = @transform_6, window_bounds = array<i64: 64, 32>}, {pipeline_mode = #tpu.pipeline_mode<synchronous>, transform_indices = @transform_7, window_bounds = array<i64: 1, 32>}, {pipeline_mode = #tpu.pipeline_mode<synchronous>, transform_indices = @transform_8, window_bounds = array<i64: 8, 128>}, {transform_indices = @transform_9, window_bounds = array<i64: 1, 1, 256>}]} {
    %c0_i32 = arith.constant 0 : i32
    %c256_i32 = arith.constant 256 : i32
    %0 = arith.muli %c0_i32, %c256_i32 : i32
    %1 = tpu.assume_multiple %0, 256 : i32
    %2 = arith.index_cast %1 : i32 to index
    %c0 = arith.constant 0 : index
    %3 = vector.load %arg1[%2, %c0] : memref<256x32xf32, #tpu.memory_space<vmem>>, vector<256x32xf32>
    %4 = arith.truncf %3 : vector<256x32xf32> to vector<256x32xbf16>
    %c0_0 = arith.constant 0 : index
    %c0_1 = arith.constant 0 : index
    %5 = vector.load %arg9[%c0_0, %c0_1] : memref<8x128xf32, #tpu.memory_space<vmem>>, vector<1x32xf32>
    %c0_2 = arith.constant 0 : index
    %c0_3 = arith.constant 0 : index
    %6 = vector.load %arg2[%c0_2, %c0_3] : memref<32x32xbf16, #tpu.memory_space<vmem>>, vector<32x32xbf16>
    %cst = arith.constant dense<0.000000e+00> : vector<256x32xf32>
    %7 = tpu.matmul %4, %6, %cst {dimension_numbers = #tpu.dot_dimension_numbers<[1], [0], [0], [1], [0, 0, 1, 1], [], []>} : vector<256x32xbf16>, vector<32x32xbf16>, vector<256x32xf32> -> vector<256x32xf32>
    %8 = vector.broadcast %5 : vector<1x32xf32> to vector<256x32xf32>
    %9 = arith.addf %7, %8 : vector<256x32xf32>
    %10 = math.tanh %9 : vector<256x32xf32>
    %11 = arith.truncf %10 : vector<256x32xf32> to vector<256x32xbf16>
    %c1 = arith.constant 1 : index
    %c0_4 = arith.constant 0 : index
    %12 = vector.load %arg9[%c1, %c0_4] : memref<8x128xf32, #tpu.memory_space<vmem>>, vector<1x16xf32>
    %c0_5 = arith.constant 0 : index
    %c0_6 = arith.constant 0 : index
    %13 = vector.load %arg3[%c0_5, %c0_6] : memref<32x16xbf16, #tpu.memory_space<vmem>>, vector<32x16xbf16>
    %cst_7 = arith.constant dense<0.000000e+00> : vector<256x16xf32>
    %14 = tpu.matmul %11, %13, %cst_7 {dimension_numbers = #tpu.dot_dimension_numbers<[1], [0], [0], [1], [0, 0, 1, 1], [], []>} : vector<256x32xbf16>, vector<32x16xbf16>, vector<256x16xf32> -> vector<256x16xf32>
    %15 = vector.broadcast %12 : vector<1x16xf32> to vector<256x16xf32>
    %16 = arith.addf %14, %15 : vector<256x16xf32>
    %17 = math.tanh %16 : vector<256x16xf32>
    %18 = arith.truncf %17 : vector<256x16xf32> to vector<256x16xbf16>
    %c2 = arith.constant 2 : index
    %c0_8 = arith.constant 0 : index
    %19 = vector.load %arg9[%c2, %c0_8] : memref<8x128xf32, #tpu.memory_space<vmem>>, vector<1x12xf32>
    %c0_9 = arith.constant 0 : index
    %c0_10 = arith.constant 0 : index
    %20 = vector.load %arg4[%c0_9, %c0_10] : memref<16x12xbf16, #tpu.memory_space<vmem>>, vector<16x12xbf16>
    %cst_11 = arith.constant dense<0.000000e+00> : vector<256x12xf32>
    %21 = tpu.matmul %18, %20, %cst_11 {dimension_numbers = #tpu.dot_dimension_numbers<[1], [0], [0], [1], [0, 0, 1, 1], [], []>} : vector<256x16xbf16>, vector<16x12xbf16>, vector<256x12xf32> -> vector<256x12xf32>
    %22 = vector.broadcast %19 : vector<1x12xf32> to vector<256x12xf32>
    %23 = arith.addf %21, %22 : vector<256x12xf32>
    %24 = math.tanh %23 : vector<256x12xf32>
    %25 = arith.truncf %24 : vector<256x12xf32> to vector<256x12xbf16>
    %c3 = arith.constant 3 : index
    %c0_12 = arith.constant 0 : index
    %26 = vector.load %arg9[%c3, %c0_12] : memref<8x128xf32, #tpu.memory_space<vmem>>, vector<1x32xf32>
    %c0_13 = arith.constant 0 : index
    %c0_14 = arith.constant 0 : index
    %27 = vector.load %arg5[%c0_13, %c0_14] : memref<12x32xbf16, #tpu.memory_space<vmem>>, vector<12x32xbf16>
    %cst_15 = arith.constant dense<0.000000e+00> : vector<256x32xf32>
    %28 = tpu.matmul %25, %27, %cst_15 {dimension_numbers = #tpu.dot_dimension_numbers<[1], [0], [0], [1], [0, 0, 1, 1], [], []>} : vector<256x12xbf16>, vector<12x32xbf16>, vector<256x32xf32> -> vector<256x32xf32>
    %29 = vector.broadcast %26 : vector<1x32xf32> to vector<256x32xf32>
    %30 = arith.addf %28, %29 : vector<256x32xf32>
    %cst_16 = arith.constant 0.000000e+00 : f32
    %31 = vector.broadcast %cst_16 : f32 to vector<256x32xf32>
    %32 = arith.maximumf %30, %31 : vector<256x32xf32>
    %33 = arith.truncf %32 : vector<256x32xf32> to vector<256x32xbf16>
    %c4 = arith.constant 4 : index
    %c0_17 = arith.constant 0 : index
    %34 = vector.load %arg9[%c4, %c0_17] : memref<8x128xf32, #tpu.memory_space<vmem>>, vector<1x64xf32>
    %c0_18 = arith.constant 0 : index
    %c0_19 = arith.constant 0 : index
    %35 = vector.load %arg6[%c0_18, %c0_19] : memref<32x64xbf16, #tpu.memory_space<vmem>>, vector<32x64xbf16>
    %cst_20 = arith.constant dense<0.000000e+00> : vector<256x64xf32>
    %36 = tpu.matmul %33, %35, %cst_20 {dimension_numbers = #tpu.dot_dimension_numbers<[1], [0], [0], [1], [0, 0, 1, 1], [], []>} : vector<256x32xbf16>, vector<32x64xbf16>, vector<256x64xf32> -> vector<256x64xf32>
    %37 = vector.broadcast %34 : vector<1x64xf32> to vector<256x64xf32>
    %38 = arith.addf %36, %37 : vector<256x64xf32>
    %cst_21 = arith.constant 0.000000e+00 : f32
    %39 = vector.broadcast %cst_21 : f32 to vector<256x64xf32>
    %40 = arith.maximumf %38, %39 : vector<256x64xf32>
    %41 = arith.truncf %40 : vector<256x64xf32> to vector<256x64xbf16>
    %c5 = arith.constant 5 : index
    %c0_22 = arith.constant 0 : index
    %42 = vector.load %arg9[%c5, %c0_22] : memref<8x128xf32, #tpu.memory_space<vmem>>, vector<1x32xf32>
    %c0_23 = arith.constant 0 : index
    %c0_24 = arith.constant 0 : index
    %43 = vector.load %arg7[%c0_23, %c0_24] : memref<64x32xbf16, #tpu.memory_space<vmem>>, vector<64x32xbf16>
    %cst_25 = arith.constant dense<0.000000e+00> : vector<256x32xf32>
    %44 = tpu.matmul %41, %43, %cst_25 {dimension_numbers = #tpu.dot_dimension_numbers<[1], [0], [0], [1], [0, 0, 1, 1], [], []>} : vector<256x64xbf16>, vector<64x32xbf16>, vector<256x32xf32> -> vector<256x32xf32>
    %45 = vector.broadcast %42 : vector<1x32xf32> to vector<256x32xf32>
    %46 = arith.addf %44, %45 : vector<256x32xf32>
    %cst_26 = arith.constant 0.000000e+00 : f32
    %47 = vector.broadcast %cst_26 : f32 to vector<256x32xf32>
    %48 = arith.maximumf %46, %47 : vector<256x32xf32>
    %49 = arith.truncf %48 : vector<256x32xf32> to vector<256x32xbf16>
    %c0_27 = arith.constant 0 : index
    %c0_28 = arith.constant 0 : index
    %50 = vector.load %arg8[%c0_27, %c0_28] : memref<1x32xbf16, #tpu.memory_space<vmem>>, vector<1x32xbf16>
    %cst_29 = arith.constant dense<0.000000e+00> : vector<1x256xf32>
    %51 = tpu.matmul %50, %49, %cst_29 {dimension_numbers = #tpu.dot_dimension_numbers<[1], [1], [0], [0], [0, 0, 1, 0], [], []>} : vector<1x32xbf16>, vector<256x32xbf16>, vector<1x256xf32> -> vector<1x256xf32>
    %c6 = arith.constant 6 : index
    %c0_30 = arith.constant 0 : index
    %52 = vector.load %arg9[%c6, %c0_30] : memref<8x128xf32, #tpu.memory_space<vmem>>, vector<1x1xf32>
    %53 = vector.broadcast %52 : vector<1x1xf32> to vector<1x256xf32>
    %54 = arith.addf %51, %53 : vector<1x256xf32>
    %55 = arith.negf %54 : vector<1x256xf32>
    %56 = math.exp %55 : vector<1x256xf32>
    %cst_31 = arith.constant 1.000000e+00 : f32
    %57 = vector.broadcast %cst_31 : f32 to vector<1x256xf32>
    %58 = arith.addf %57, %56 : vector<1x256xf32>
    %59 = arith.divf %57, %58 : vector<1x256xf32>
    %c0_32 = arith.constant 0 : index
    %60 = arith.index_cast %c0_i32 : i32 to index
    %c0_33 = arith.constant 0 : index
    %61 = vector.load %arg10[%c0_32, %60, %c0_33] : memref<1x1x256xf32, #tpu.memory_space<vmem>>, vector<1x1x256xf32>
    %62 = vector.shape_cast %61 : vector<1x1x256xf32> to vector<1x256xf32>
    %63 = vector.shape_cast %59 : vector<1x256xf32> to vector<1x1x256xf32>
    tpu.vector_store %arg10[%c0_32, %60, %c0_33], %63 {strides = array<i32>} : memref<1x1x256xf32, #tpu.memory_space<vmem>>, vector<1x1x256xf32>,
    %c1_i32 = arith.constant 1 : i32
    return
  }
  func.func @transform_0(%arg0: i32) -> (i32, i32) {
    %c0_i32 = arith.constant 0 : i32
    %c0_i32_0 = arith.constant 0 : i32
    return %arg0, %c0_i32 : i32, i32
  }
  func.func @transform_1(%arg0: i32) -> (i32, i32) {
    %c0_i32 = arith.constant 0 : i32
    %c0_i32_0 = arith.constant 0 : i32
    %c0_i32_1 = arith.constant 0 : i32
    return %c0_i32, %c0_i32_0 : i32, i32
  }
  func.func @transform_2(%arg0: i32) -> (i32, i32) {
    %c0_i32 = arith.constant 0 : i32
    %c0_i32_0 = arith.constant 0 : i32
    %c0_i32_1 = arith.constant 0 : i32
    return %c0_i32, %c0_i32_0 : i32, i32
  }
  func.func @transform_3(%arg0: i32) -> (i32, i32) {
    %c0_i32 = arith.constant 0 : i32
    %c0_i32_0 = arith.constant 0 : i32
    %c0_i32_1 = arith.constant 0 : i32
    return %c0_i32, %c0_i32_0 : i32, i32
  }
  func.func @transform_4(%arg0: i32) -> (i32, i32) {
    %c0_i32 = arith.constant 0 : i32
    %c0_i32_0 = arith.constant 0 : i32
    %c0_i32_1 = arith.constant 0 : i32
    return %c0_i32, %c0_i32_0 : i32, i32
  }
  func.func @transform_5(%arg0: i32) -> (i32, i32) {
    %c0_i32 = arith.constant 0 : i32
    %c0_i32_0 = arith.constant 0 : i32
    %c0_i32_1 = arith.constant 0 : i32
    return %c0_i32, %c0_i32_0 : i32, i32
  }
  func.func @transform_6(%arg0: i32) -> (i32, i32) {
    %c0_i32 = arith.constant 0 : i32
    %c0_i32_0 = arith.constant 0 : i32
    %c0_i32_1 = arith.constant 0 : i32
    return %c0_i32, %c0_i32_0 : i32, i32
  }
  func.func @transform_7(%arg0: i32) -> (i32, i32) {
    %c0_i32 = arith.constant 0 : i32
    %c0_i32_0 = arith.constant 0 : i32
    %c0_i32_1 = arith.constant 0 : i32
    return %c0_i32, %c0_i32_0 : i32, i32
  }
  func.func @transform_8(%arg0: i32) -> (i32, i32) {
    %c0_i32 = arith.constant 0 : i32
    %c0_i32_0 = arith.constant 0 : i32
    %c0_i32_1 = arith.constant 0 : i32
    return %c0_i32, %c0_i32_0 : i32, i32
  }
  func.func @transform_9(%arg0: i32) -> (i32, i32, i32) {
    %c0_i32 = arith.constant 0 : i32
    %c0_i32_0 = arith.constant 0 : i32
    %c0_i32_1 = arith.constant 0 : i32
    return %arg0, %c0_i32, %c0_i32_0 : i32, i32, i32
  }
}

</mosaic_0001>

<bundles_post_ra>
// kernel: autoencoder_forward.1
= control target key start
LH: loop header
LB: loop body
LE: loop exit
PB: predicated region body
PF: predicated region fallthrough
CT: control target
= control target key end

     0   :  { %vm102_vm0 = vcmask 261120   ;;  %vm970_vm1 = vcmask 1045504   ;;  %vm651_vm2 = vcmask 130048   ;;  %vm921_vm3 = vcmask 97280   ;;  %s3134_s1 = inlined_call_operand.vmem [shape: bf16[32,32], index: 1, kind: input, shape index: {}]   ;;  %s3135_s0 = inlined_call_operand.vmem [shape: f32[256,32], index: 0, kind: input, shape index: {}]   ;;  %s3136_s2 = inlined_call_operand.vmem [shape: bf16[32,16], index: 2, kind: input, shape index: {}]   ;;  %s3137_s3 = inlined_call_operand.vmem [shape: bf16[16,12], index: 3, kind: input, shape index: {}]   ;;  %s3138_s8 = inlined_call_operand.vmem [shape: f32[8,128], index: 8, kind: input, shape index: {}]   ;;  %s3139_s4 = inlined_call_operand.vmem [shape: bf16[12,32], index: 4, kind: input, shape index: {}]   ;;  %s3140_s5 = inlined_call_operand.vmem [shape: bf16[32,64], index: 5, kind: input, shape index: {}]   ;;  %s3141_s6 = inlined_call_operand.vmem [shape: bf16[64,32], index: 6, kind: input, shape index: {}]   ;;  %s3142_s7 = inlined_call_operand.vmem [shape: bf16[1,32], index: 7, kind: input, shape index: {}]   ;;  %s3143_s9 = inlined_call_operand.vmem [shape: f32[1,1,256], index: 9, kind: output, shape index: {}]  }
   0x1   :  { %v2365_v0 = vld [vmem:[%s3134_s1] sm:$0xff]   ;;  %v2366_v1 = vld [vmem:[%s3134_s1 + $0x8] sm:$0xff]   ;;  %v35_v5 = vld [vmem:[%s3135_s0 + $0x10] sm:$0xff]  ;;  %vm1498_vm4 = vcmask 523264  }
   0x2   :  { %2137 = vmatprep.subr.bf16.mxu0 %v2365_v0  ;;  %v33_v2 = vld [vmem:[%s3135_s0] sm:$0xff]  ;;  %v34_v3 = vld [vmem:[%s3135_s0 + $0x8] sm:$0xff]  ;;  %v36_v6 = vld [vmem:[%s3135_s0 + $0x18] sm:$0xff] }
   0x3   :  { %2138 = vmatpush3.bf16.msra.mxu0 %v2365_v0  ;;  %v65_v4 = vpack.c.bf16 %v34_v3, %v33_v2  ;;  %v37_v7 = vld [vmem:[%s3135_s0 + $0x20] sm:$0xff]  ;;  %v38_v8 = vld [vmem:[%s3135_s0 + $0x28] sm:$0xff]  ;;  %v66_v9 = vpack.c.bf16 %v36_v6, %v35_v5  ;;  %v39_v11 = vld [vmem:[%s3135_s0 + $0x30] sm:$0xff] }
   0x4   :  { %2139 = vmatprep.subr.bf16.mxu0 %v2366_v1  ;;  %v67_v10 = vpack.c.bf16 %v38_v8, %v37_v7  ;;  %v40_v12 = vld [vmem:[%s3135_s0 + $0x38] sm:$0xff]  ;;  %v41_v13 = vld [vmem:[%s3135_s0 + $0x40] sm:$0xff]  ;;  %v42_v14 = vld [vmem:[%s3135_s0 + $0x48] sm:$0xff] }
   0x5   :  { %2141 = vmatprep.mubr.msk.bf16.mxu0 %vm102_vm0, %v65_v4  ;;  %v68_v15 = vpack.c.bf16 %v40_v12, %v39_v11  ;;  %v69_v16 = vpack.c.bf16 %v42_v14, %v41_v13  ;;  %v43_v17 = vld [vmem:[%s3135_s0 + $0x50] sm:$0xff]  ;;  %v44_v18 = vld [vmem:[%s3135_s0 + $0x58] sm:$0xff]  ;;  %v45_v19 = vld [vmem:[%s3135_s0 + $0x60] sm:$0xff] }
   0x6   :  { %v46_v20 = vld [vmem:[%s3135_s0 + $0x68] sm:$0xff]  ;;  %v70_v21 = vpack.c.bf16 %v44_v18, %v43_v17  ;;  %v47_v23 = vld [vmem:[%s3135_s0 + $0x70] sm:$0xff]  ;;  %v48_v24 = vld [vmem:[%s3135_s0 + $0x78] sm:$0xff] }
   0x7   :  { %2140 = vmatpush3.bf16.msra.mxu0 %v2366_v1  ;;  %v71_v22 = vpack.c.bf16 %v46_v20, %v45_v19  ;;  %v49_v25 = vld [vmem:[%s3135_s0 + $0x80] sm:$0xff]  ;;  %v50_v26 = vld [vmem:[%s3135_s0 + $0x88] sm:$0xff]  ;;  %v72_v27 = vpack.c.bf16 %v48_v24, %v47_v23  ;;  %v51_v29 = vld [vmem:[%s3135_s0 + $0x90] sm:$0xff] }
   0x8   :  { %v73_v28 = vpack.c.bf16 %v50_v26, %v49_v25  ;;  %v52_v30 = vld [vmem:[%s3135_s0 + $0x98] sm:$0xff]  ;;  %v53_v31 = vld [vmem:[%s3135_s0 + $0xa0] sm:$0xff]  ;;  %v54_v32 = vld [vmem:[%s3135_s0 + $0xa8] sm:$0xff] }
   0x9   :  { %v74_v33 = vpack.c.bf16 %v52_v30, %v51_v29  ;;  %v75_v34 = vpack.c.bf16 %v54_v32, %v53_v31  ;;  %v55_v35 = vld [vmem:[%s3135_s0 + $0xb0] sm:$0xff]  ;;  %v56_v36 = vld [vmem:[%s3135_s0 + $0xb8] sm:$0xff]  ;;  %v57_v37 = vld [vmem:[%s3135_s0 + $0xc0] sm:$0xff] }
   0xa   :  { %2142 = vmatmul.mubr.msk.bf16.vlgmr.msra.gmra.mrb[0].mxu0 %vm102_vm0, %v66_v9  ;;  %v58_v38 = vld [vmem:[%s3135_s0 + $0xc8] sm:$0xff]  ;;  %v76_v39 = vpack.c.bf16 %v56_v36, %v55_v35  ;;  %v59_v41 = vld [vmem:[%s3135_s0 + $0xd0] sm:$0xff]  ;;  %v60_v42 = vld [vmem:[%s3135_s0 + $0xd8] sm:$0xff] }
   0xb   :  { %2145 = vmatprep.mubr.msk.bf16.mxu0 %vm102_vm0, %v67_v10  ;;  %v77_v40 = vpack.c.bf16 %v58_v38, %v57_v37  ;;  %v61_v43 = vld [vmem:[%s3135_s0 + $0xe0] sm:$0xff]  ;;  %v62_v44 = vld [vmem:[%s3135_s0 + $0xe8] sm:$0xff]  ;;  %v78_v45 = vpack.c.bf16 %v60_v42, %v59_v41  ;;  %v63_v47 = vld [vmem:[%s3135_s0 + $0xf0] sm:$0xff] }
   0xc   :  { %v79_v46 = vpack.c.bf16 %v62_v44, %v61_v43  ;;  %v64_v48 = vld [vmem:[%s3135_s0 + $0xf8] sm:$0xff]  ;;  %v2367_v50 = vld [vmem:[%s3136_s2] sm:$0xff]   ;;  %v2368_v51 = vld [vmem:[%s3136_s2 + $0x8] sm:$0xff]  }
   0xd   :  { %v80_v49 = vpack.c.bf16 %v64_v48, %v63_v47  ;;  %2173 = vmatprep.subr.bf16.mxu1 %v2367_v50  ;;  %v2369_v52 = vld [vmem:[%s3137_s3] sm:$0xff]  }
   0xe   :  { %2174 = vmatpush3.bf16.msra.mxu1 %v2367_v50  ;;  %2209 = vmatprep.subr.bf16.mxu0 %v2369_v52  ;;  %v2759_v53 = vld [vmem:[%s3138_s8] ss:$0 sm:$0xff] }
   0xf   :  { %2175 = vmatprep.subr.bf16.mxu1 %v2368_v51  ;;  %2210 = vmatpush3.bf16.msra.mxu0 %v2369_v52 }
  0x12   :  { %2146 = vmatmul.mubr.msk.bf16.gmra.mrb[4].mxu0 %vm102_vm0, %v68_v15  ;;  %2176 = vmatpush3.bf16.msra.mxu1 %v2368_v51 }
  0x13   :  { %2149 = vmatprep.mubr.msk.bf16.mxu0 %vm102_vm0, %v69_v16 }
  0x1a   :  { %2150 = vmatmul.mubr.msk.bf16.gmra.mrb[8].mxu0 %vm102_vm0, %v70_v21 }
  0x1b   :  { %2153 = vmatprep.mubr.msk.bf16.mxu0 %vm102_vm0, %v71_v22 }
  0x22   :  { %2154 = vmatmul.mubr.msk.bf16.gmra.mrb[12].mxu0 %vm102_vm0, %v72_v27 }
  0x23   :  { %2157 = vmatprep.mubr.msk.bf16.mxu0 %vm102_vm0, %v73_v28 }
  0x2a   :  { %2158 = vmatmul.mubr.msk.bf16.gmra.mrb[16].mxu0 %vm102_vm0, %v74_v33 }
  0x2b   :  { %2161 = vmatprep.mubr.msk.bf16.mxu0 %vm102_vm0, %v75_v34 }
  0x32   :  { %2162 = vmatmul.mubr.msk.bf16.gmra.mrb[20].mxu0 %vm102_vm0, %v76_v39 }
  0x33   :  { %2165 = vmatprep.mubr.msk.bf16.mxu0 %vm102_vm0, %v77_v40 }
  0x3a   :  { %2166 = vmatmul.mubr.msk.bf16.gmra.mrb[24].mxu0 %vm102_vm0, %v78_v45 }
  0x3b   :  { %2169 = vmatprep.mubr.msk.bf16.mxu0 %vm102_vm0, %v79_v46 }
  0x42   :  { %2170 = vmatmul.mubr.msk.bf16.gmra.mrb[28].mxu0 %vm102_vm0, %v80_v49 }
  0xdd   :  { %v2143_v54 = vpop.f32.mrb[0].mxu0 }
  0xde   :  { %v194_v55 = vadd.f32 %v2143_v54, %v2759_v53  ;;  %v185_v56 = vpop.f32.mrb[1].mxu0 }
  0xdf   :  { %v186_v57 = vadd.f32 %v2759_v53, %v185_v56  ;;  %v2144_v58 = vpop.f32.mrb[2].mxu0 }
  0xe0   :  { %2377 = vtanh.f32 %v194_v55  ;;  %v197_v59 = vadd.f32 %v2144_v58, %v2759_v53  ;;  %v188_v60 = vpop.f32.mrb[3].mxu0 }
  0xe1   :  { %2379 = vtanh.f32 %v186_v57  ;;  %v189_v61 = vadd.f32 %v2759_v53, %v188_v60 }
  0xe2   :  { %2381 = vtanh.f32 %v197_v59 }
  0xe3   :  { %2383 = vtanh.f32 %v189_v61 }
  0xe5   :  { %v2147_v62 = vpop.f32.mrb[4].mxu0 }
  0xe6   :  { %v210_v63 = vadd.f32 %v2147_v62, %v2759_v53  ;;  %v201_v0 = vpop.f32.mrb[5].mxu0 }
  0xe7   :  { %v202_v1 = vadd.f32 %v2759_v53, %v201_v0  ;;  %v2148_v2 = vpop.f32.mrb[6].mxu0 }
  0xe8   :  { %2385 = vtanh.f32 %v210_v63  ;;  %v213_v3 = vadd.f32 %v2148_v2, %v2759_v53  ;;  %v204_v4 = vpop.f32.mrb[7].mxu0 }
  0xe9   :  { %2387 = vtanh.f32 %v202_v1  ;;  %v205_v5 = vadd.f32 %v2759_v53, %v204_v4 }
  0xea   :  { %v2378_v6 = vpop.eup %2377  ;;  %2389 = vtanh.f32 %v213_v3 }
  0xeb   :  { %v2380_v7 = vpop.eup %2379  ;;  %2391 = vtanh.f32 %v205_v5 }
  0xec   :  { %v2382_v8 = vpop.eup %2381 }
  0xed   :  { %v2384_v9 = vpop.eup %2383  ;;  %v2151_v10 = vpop.f32.mrb[8].mxu0  ;;  %v345_v11 = vpack.c.bf16 %v2382_v8, %v2378_v6 }
  0xee   :  { %v226_v12 = vadd.f32 %v2151_v10, %v2759_v53  ;;  %v217_v13 = vpop.f32.mrb[9].mxu0  ;;  %v344_v14 = vpack.c.bf16 %v2384_v9, %v2380_v7 }
  0xef   :  { %v218_v15 = vadd.f32 %v2759_v53, %v217_v13  ;;  %v2152_v16 = vpop.f32.mrb[10].mxu0 }
  0xf0   :  { %2393 = vtanh.f32 %v226_v12  ;;  %v229_v17 = vadd.f32 %v2152_v16, %v2759_v53  ;;  %v220_v18 = vpop.f32.mrb[11].mxu0  ;;  %2177 = vmatprep.mubr.msk.bf16.mxu1 %vm102_vm0, %v344_v14 }
  0xf1   :  { %2395 = vtanh.f32 %v218_v15  ;;  %v221_v19 = vadd.f32 %v2759_v53, %v220_v18  ;;  %2178 = vmatmul.mubr.msk.bf16.vlgmr.msra.gmra.mrb[0].mxu1 %vm102_vm0, %v345_v11 }
  0xf2   :  { %v2386_v20 = vpop.eup %2385  ;;  %2397 = vtanh.f32 %v229_v17 }
  0xf3   :  { %v2388_v21 = vpop.eup %2387  ;;  %2399 = vtanh.f32 %v221_v19 }
  0xf4   :  { %v2390_v22 = vpop.eup %2389 }
  0xf5   :  { %v2392_v23 = vpop.eup %2391  ;;  %v2155_v24 = vpop.f32.mrb[12].mxu0  ;;  %v347_v25 = vpack.c.bf16 %v2390_v22, %v2386_v20 }
  0xf6   :  { %v242_v26 = vadd.f32 %v2155_v24, %v2759_v53  ;;  %v233_v27 = vpop.f32.mrb[13].mxu0  ;;  %v346_v28 = vpack.c.bf16 %v2392_v23, %v2388_v21 }
  0xf7   :  { %v234_v29 = vadd.f32 %v2759_v53, %v233_v27  ;;  %v2156_v30 = vpop.f32.mrb[14].mxu0 }
  0xf8   :  { %2401 = vtanh.f32 %v242_v26  ;;  %v245_v31 = vadd.f32 %v2156_v30, %v2759_v53  ;;  %v236_v32 = vpop.f32.mrb[15].mxu0  ;;  %2181 = vmatprep.mubr.msk.bf16.mxu1 %vm102_vm0, %v346_v28 }
  0xf9   :  { %2403 = vtanh.f32 %v234_v29  ;;  %v237_v33 = vadd.f32 %v2759_v53, %v236_v32  ;;  %2182 = vmatmul.mubr.msk.bf16.gmra.mrb[4].mxu1 %vm102_vm0, %v347_v25 }
  0xfa   :  { %v2394_v34 = vpop.eup %2393  ;;  %2405 = vtanh.f32 %v245_v31 }
  0xfb   :  { %v2396_v35 = vpop.eup %2395  ;;  %2407 = vtanh.f32 %v237_v33 }
  0xfc   :  { %v2398_v36 = vpop.eup %2397 }
  0xfd   :  { %v2400_v37 = vpop.eup %2399  ;;  %v2159_v38 = vpop.f32.mrb[16].mxu0  ;;  %v349_v39 = vpack.c.bf16 %v2398_v36, %v2394_v34 }
  0xfe   :  { %v258_v40 = vadd.f32 %v2159_v38, %v2759_v53  ;;  %v249_v41 = vpop.f32.mrb[17].mxu0  ;;  %v348_v42 = vpack.c.bf16 %v2400_v37, %v2396_v35  ;;  %v2370_v38 = vld [vmem:[%s3139_s4] sm:$0x3f]  }
  0xff   :  { %v250_v43 = vadd.f32 %v2759_v53, %v249_v41  ;;  %v2160_v44 = vpop.f32.mrb[18].mxu0  ;;  %2353 = vmatprep.subr.msk.bf16.mxu1 %vm970_vm1, %v2370_v38 }
 0x100   :  { %2409 = vtanh.f32 %v258_v40  ;;  %v261_v45 = vadd.f32 %v2160_v44, %v2759_v53  ;;  %v252_v46 = vpop.f32.mrb[19].mxu0  ;;  %2185 = vmatprep.mubr.msk.bf16.mxu1 %vm102_vm0, %v348_v42  ;;  %v2815_v40 = vld [vmem:[%s3138_s8 + $0x1] ss:$0 sm:$0xff] }
 0x101   :  { %2411 = vtanh.f32 %v250_v43  ;;  %v253_v47 = vadd.f32 %v2759_v53, %v252_v46  ;;  %2186 = vmatmul.mubr.msk.bf16.gmra.mrb[8].mxu1 %vm102_vm0, %v349_v39  ;;  %v972_v39 = vsel %vm970_vm1, %v2370_v38, 0 }
 0x102   :  { %v2402_v48 = vpop.eup %2401  ;;  %2413 = vtanh.f32 %v261_v45  ;;  %2244 = vmatpush3.bf16.msra.mxu1 %v972_v39 }
 0x103   :  { %v2404_v49 = vpop.eup %2403  ;;  %2415 = vtanh.f32 %v253_v47 }
 0x104   :  { %v2406_v50 = vpop.eup %2405 }
 0x105   :  { %v2408_v51 = vpop.eup %2407  ;;  %v2163_v52 = vpop.f32.mrb[20].mxu0  ;;  %v351_v54 = vpack.c.bf16 %v2406_v50, %v2402_v48 }
 0x106   :  { %v274_v55 = vadd.f32 %v2163_v52, %v2759_v53  ;;  %v265_v56 = vpop.f32.mrb[21].mxu0  ;;  %v350_v57 = vpack.c.bf16 %v2408_v51, %v2404_v49 }
 0x107   :  { %v266_v58 = vadd.f32 %v2759_v53, %v265_v56  ;;  %v2164_v59 = vpop.f32.mrb[22].mxu0 }
 0x108   :  { %2417 = vtanh.f32 %v274_v55  ;;  %v277_v60 = vadd.f32 %v2164_v59, %v2759_v53  ;;  %v268_v61 = vpop.f32.mrb[23].mxu0  ;;  %2189 = vmatprep.mubr.msk.bf16.mxu1 %vm102_vm0, %v350_v57 }
 0x109   :  { %2419 = vtanh.f32 %v266_v58  ;;  %v269_v62 = vadd.f32 %v2759_v53, %v268_v61  ;;  %2190 = vmatmul.mubr.msk.bf16.gmra.mrb[12].mxu1 %vm102_vm0, %v351_v54 }
 0x10a   :  { %v2410_v63 = vpop.eup %2409  ;;  %2421 = vtanh.f32 %v277_v60 }
 0x10b   :  { %v2412_v0 = vpop.eup %2411  ;;  %2423 = vtanh.f32 %v269_v62 }
 0x10c   :  { %v2414_v1 = vpop.eup %2413 }
 0x10d   :  { %v2416_v2 = vpop.eup %2415  ;;  %v2167_v3 = vpop.f32.mrb[24].mxu0  ;;  %v353_v4 = vpack.c.bf16 %v2414_v1, %v2410_v63 }
 0x10e   :  { %v290_v5 = vadd.f32 %v2167_v3, %v2759_v53  ;;  %v281_v6 = vpop.f32.mrb[25].mxu0  ;;  %v352_v7 = vpack.c.bf16 %v2416_v2, %v2412_v0 }
 0x10f   :  { %v282_v8 = vadd.f32 %v2759_v53, %v281_v6  ;;  %v2168_v9 = vpop.f32.mrb[26].mxu0 }
 0x110   :  { %2425 = vtanh.f32 %v290_v5  ;;  %v293_v10 = vadd.f32 %v2168_v9, %v2759_v53  ;;  %v284_v11 = vpop.f32.mrb[27].mxu0  ;;  %2193 = vmatprep.mubr.msk.bf16.mxu1 %vm102_vm0, %v352_v7 }
 0x111   :  { %2427 = vtanh.f32 %v282_v8  ;;  %v285_v12 = vadd.f32 %v2759_v53, %v284_v11  ;;  %2194 = vmatmul.mubr.msk.bf16.gmra.mrb[16].mxu1 %vm102_vm0, %v353_v4 }
 0x112   :  { %v2418_v13 = vpop.eup %2417  ;;  %2429 = vtanh.f32 %v293_v10 }
 0x113   :  { %v2420_v14 = vpop.eup %2419  ;;  %2431 = vtanh.f32 %v285_v12 }
 0x114   :  { %v2422_v15 = vpop.eup %2421 }
 0x115   :  { %v2424_v16 = vpop.eup %2423  ;;  %v2171_v17 = vpop.f32.mrb[28].mxu0  ;;  %v355_v18 = vpack.c.bf16 %v2422_v15, %v2418_v13 }
 0x116   :  { %v306_v19 = vadd.f32 %v2171_v17, %v2759_v53  ;;  %v297_v20 = vpop.f32.mrb[29].mxu0  ;;  %v354_v21 = vpack.c.bf16 %v2424_v16, %v2420_v14 }
 0x117   :  { %v298_v22 = vadd.f32 %v2759_v53, %v297_v20  ;;  %v2172_v23 = vpop.f32.mrb[30].mxu0 }
 0x118   :  { %2433 = vtanh.f32 %v306_v19  ;;  %v309_v24 = vadd.f32 %v2172_v23, %v2759_v53  ;;  %2197 = vmatprep.mubr.msk.bf16.mxu1 %vm102_vm0, %v354_v21  ;;  %v300_v25 = vpop.f32.mrb[31].mxu0 }
 0x119   :  { %2435 = vtanh.f32 %v298_v22  ;;  %v301_v26 = vadd.f32 %v2759_v53, %v300_v25  ;;  %2198 = vmatmul.mubr.msk.bf16.gmra.mrb[20].mxu1 %vm102_vm0, %v355_v18 }
 0x11a   :  { %v2426_v27 = vpop.eup %2425  ;;  %2437 = vtanh.f32 %v309_v24 }
 0x11b   :  { %v2428_v28 = vpop.eup %2427  ;;  %2439 = vtanh.f32 %v301_v26 }
 0x11c   :  { %v2430_v29 = vpop.eup %2429 }
 0x11d   :  { %v2432_v30 = vpop.eup %2431  ;;  %v357_v31 = vpack.c.bf16 %v2430_v29, %v2426_v27 }
 0x11e   :  { %v356_v32 = vpack.c.bf16 %v2432_v30, %v2428_v28 }
 0x120   :  { %2201 = vmatprep.mubr.msk.bf16.mxu1 %vm102_vm0, %v356_v32 }
 0x121   :  { %2202 = vmatmul.mubr.msk.bf16.gmra.mrb[24].mxu1 %vm102_vm0, %v357_v31 }
 0x122   :  { %v2434_v33 = vpop.eup %2433 }
 0x123   :  { %v2436_v34 = vpop.eup %2435 }
 0x124   :  { %v2438_v35 = vpop.eup %2437 }
 0x125   :  { %v2440_v36 = vpop.eup %2439  ;;  %v359_v37 = vpack.c.bf16 %v2438_v35, %v2434_v33 }
 0x126   :  { %v358_v53 = vpack.c.bf16 %v2440_v36, %v2436_v34 }
 0x128   :  { %2205 = vmatprep.mubr.msk.bf16.mxu1 %vm102_vm0, %v358_v53 }
 0x129   :  { %2206 = vmatmul.mubr.msk.bf16.gmra.mrb[28].mxu1 %vm102_vm0, %v359_v37 }
 0x1c4   :  { %v2179_v41 = vpop.f32.mrb[0].mxu1 }
 0x1c5   :  { %v472_v42 = vadd.f32 %v2179_v41, %v2815_v40  ;;  %v463_v43 = vpop.f32.mrb[1].mxu1 }
 0x1c6   :  { %v464_v44 = vadd.f32 %v2815_v40, %v463_v43  ;;  %v2180_v45 = vpop.f32.mrb[2].mxu1 }
 0x1c7   :  { %2441 = vtanh.f32 %v472_v42  ;;  %v475_v46 = vadd.f32 %v2180_v45, %v2815_v40  ;;  %v466_v47 = vpop.f32.mrb[3].mxu1 }
 0x1c8   :  { %2443 = vtanh.f32 %v464_v44  ;;  %v467_v48 = vadd.f32 %v2815_v40, %v466_v47 }
 0x1c9   :  { %2445 = vtanh.f32 %v475_v46 }
 0x1ca   :  { %2447 = vtanh.f32 %v467_v48 }
 0x1cc   :  { %v2183_v49 = vpop.f32.mrb[4].mxu1 }
 0x1cd   :  { %v488_v50 = vadd.f32 %v2183_v49, %v2815_v40  ;;  %v479_v51 = vpop.f32.mrb[5].mxu1 }
 0x1ce   :  { %v480_v52 = vadd.f32 %v2815_v40, %v479_v51  ;;  %v2184_v54 = vpop.f32.mrb[6].mxu1 }
 0x1cf   :  { %2449 = vtanh.f32 %v488_v50  ;;  %v491_v55 = vadd.f32 %v2184_v54, %v2815_v40  ;;  %v482_v56 = vpop.f32.mrb[7].mxu1 }
 0x1d0   :  { %2451 = vtanh.f32 %v480_v52  ;;  %v483_v57 = vadd.f32 %v2815_v40, %v482_v56 }
 0x1d1   :  { %v2442_v58 = vpop.eup %2441  ;;  %2453 = vtanh.f32 %v491_v55 }
 0x1d2   :  { %v2444_v59 = vpop.eup %2443  ;;  %2455 = vtanh.f32 %v483_v57 }
 0x1d3   :  { %v2446_v60 = vpop.eup %2445 }
 0x1d4   :  { %v2448_v61 = vpop.eup %2447  ;;  %v623_v62 = vpack.c.bf16 %v2446_v60, %v2442_v58  ;;  %v2187_v63 = vpop.f32.mrb[8].mxu1 }
 0x1d5   :  { %v504_v0 = vadd.f32 %v2187_v63, %v2815_v40  ;;  %v495_v1 = vpop.f32.mrb[9].mxu1  ;;  %v622_v2 = vpack.c.bf16 %v2448_v61, %v2444_v59 }
 0x1d6   :  { %v496_v3 = vadd.f32 %v2815_v40, %v495_v1  ;;  %v2188_v4 = vpop.f32.mrb[10].mxu1 }
 0x1d7   :  { %2457 = vtanh.f32 %v504_v0  ;;  %v507_v5 = vadd.f32 %v2188_v4, %v2815_v40  ;;  %v498_v6 = vpop.f32.mrb[11].mxu1  ;;  %2211 = vmatprep.mubr.msk.bf16.mxu0 %vm651_vm2, %v622_v2 }
 0x1d8   :  { %2459 = vtanh.f32 %v496_v3  ;;  %v499_v7 = vadd.f32 %v2815_v40, %v498_v6  ;;  %2212 = vmatmul.mubr.msk.bf16.vlgmr.msra.gmra.mrb[32].mxu0 %vm651_vm2, %v623_v62 }
 0x1d9   :  { %v2450_v8 = vpop.eup %2449  ;;  %2461 = vtanh.f32 %v507_v5 }
 0x1da   :  { %v2452_v9 = vpop.eup %2451  ;;  %2463 = vtanh.f32 %v499_v7 }
 0x1db   :  { %v2454_v10 = vpop.eup %2453 }
 0x1dc   :  { %v2456_v11 = vpop.eup %2455  ;;  %v2191_v12 = vpop.f32.mrb[12].mxu1  ;;  %v625_v13 = vpack.c.bf16 %v2454_v10, %v2450_v8 }
 0x1dd   :  { %v520_v14 = vadd.f32 %v2191_v12, %v2815_v40  ;;  %v511_v15 = vpop.f32.mrb[13].mxu1  ;;  %v624_v16 = vpack.c.bf16 %v2456_v11, %v2452_v9 }
 0x1de   :  { %v512_v17 = vadd.f32 %v2815_v40, %v511_v15  ;;  %v2192_v18 = vpop.f32.mrb[14].mxu1 }
 0x1df   :  { %2465 = vtanh.f32 %v520_v14  ;;  %v523_v19 = vadd.f32 %v2192_v18, %v2815_v40  ;;  %v514_v20 = vpop.f32.mrb[15].mxu1  ;;  %2215 = vmatprep.mubr.msk.bf16.mxu0 %vm651_vm2, %v624_v16 }
 0x1e0   :  { %2467 = vtanh.f32 %v512_v17  ;;  %v515_v21 = vadd.f32 %v2815_v40, %v514_v20  ;;  %2216 = vmatmul.mubr.msk.bf16.gmra.mrb[36].mxu0 %vm651_vm2, %v625_v13 }
 0x1e1   :  { %v2458_v22 = vpop.eup %2457  ;;  %2469 = vtanh.f32 %v523_v19 }
 0x1e2   :  { %v2460_v23 = vpop.eup %2459  ;;  %2471 = vtanh.f32 %v515_v21 }
 0x1e3   :  { %v2462_v24 = vpop.eup %2461 }
 0x1e4   :  { %v2464_v25 = vpop.eup %2463  ;;  %v2195_v26 = vpop.f32.mrb[16].mxu1  ;;  %v627_v27 = vpack.c.bf16 %v2462_v24, %v2458_v22 }
 0x1e5   :  { %v536_v28 = vadd.f32 %v2195_v26, %v2815_v40  ;;  %v527_v29 = vpop.f32.mrb[17].mxu1  ;;  %v626_v30 = vpack.c.bf16 %v2464_v25, %v2460_v23  ;;  %v2371_v26 = vld [vmem:[%s3140_s5] sm:$0xff]  }
 0x1e6   :  { %v528_v31 = vadd.f32 %v2815_v40, %v527_v29  ;;  %v2196_v32 = vpop.f32.mrb[18].mxu1  ;;  %2277 = vmatprep.subr.bf16.mxu0 %v2371_v26 }
 0x1e7   :  { %2473 = vtanh.f32 %v536_v28  ;;  %v539_v33 = vadd.f32 %v2196_v32, %v2815_v40  ;;  %v530_v34 = vpop.f32.mrb[19].mxu1  ;;  %2219 = vmatprep.mubr.msk.bf16.mxu0 %vm651_vm2, %v626_v30  ;;  %2278 = vmatpush3.bf16.msra.mxu0 %v2371_v26  ;;  %v2874_v28 = vld [vmem:[%s3138_s8 + $0x2] ss:$0 sm:$0xff] }
 0x1e8   :  { %2475 = vtanh.f32 %v528_v31  ;;  %v531_v35 = vadd.f32 %v2815_v40, %v530_v34  ;;  %2220 = vmatmul.mubr.msk.bf16.gmra.mrb[40].mxu0 %vm651_vm2, %v627_v27  ;;  %v2372_v27 = vld [vmem:[%s3140_s5 + $0x8] sm:$0xff]  }
 0x1e9   :  { %v2466_v36 = vpop.eup %2465  ;;  %2477 = vtanh.f32 %v539_v33  ;;  %2279 = vmatprep.subr.bf16.mxu0 %v2372_v27 }
 0x1ea   :  { %v2468_v37 = vpop.eup %2467  ;;  %2479 = vtanh.f32 %v531_v35 }
 0x1eb   :  { %v2470_v53 = vpop.eup %2469  ;;  %2280 = vmatpush3.bf16.msra.mxu0 %v2372_v27 }
 0x1ec   :  { %v2472_v38 = vpop.eup %2471  ;;  %v2199_v39 = vpop.f32.mrb[20].mxu1  ;;  %v629_v41 = vpack.c.bf16 %v2470_v53, %v2466_v36 }
 0x1ed   :  { %v552_v42 = vadd.f32 %v2199_v39, %v2815_v40  ;;  %v543_v43 = vpop.f32.mrb[21].mxu1  ;;  %v628_v44 = vpack.c.bf16 %v2472_v38, %v2468_v37 }
 0x1ee   :  { %v544_v45 = vadd.f32 %v2815_v40, %v543_v43  ;;  %v2200_v46 = vpop.f32.mrb[22].mxu1 }
 0x1ef   :  { %2481 = vtanh.f32 %v552_v42  ;;  %v555_v47 = vadd.f32 %v2200_v46, %v2815_v40  ;;  %v546_v48 = vpop.f32.mrb[23].mxu1  ;;  %2223 = vmatprep.mubr.msk.bf16.mxu0 %vm651_vm2, %v628_v44 }
 0x1f0   :  { %2483 = vtanh.f32 %v544_v45  ;;  %v547_v49 = vadd.f32 %v2815_v40, %v546_v48  ;;  %2224 = vmatmul.mubr.msk.bf16.gmra.mrb[44].mxu0 %vm651_vm2, %v629_v41 }
 0x1f1   :  { %v2474_v50 = vpop.eup %2473  ;;  %2485 = vtanh.f32 %v555_v47 }
 0x1f2   :  { %v2476_v51 = vpop.eup %2475  ;;  %2487 = vtanh.f32 %v547_v49 }
 0x1f3   :  { %v2478_v52 = vpop.eup %2477 }
 0x1f4   :  { %v2480_v54 = vpop.eup %2479  ;;  %v2203_v55 = vpop.f32.mrb[24].mxu1  ;;  %v631_v56 = vpack.c.bf16 %v2478_v52, %v2474_v50 }
 0x1f5   :  { %v568_v57 = vadd.f32 %v2203_v55, %v2815_v40  ;;  %v559_v58 = vpop.f32.mrb[25].mxu1  ;;  %v630_v59 = vpack.c.bf16 %v2480_v54, %v2476_v51 }
 0x1f6   :  { %v560_v60 = vadd.f32 %v2815_v40, %v559_v58  ;;  %v2204_v61 = vpop.f32.mrb[26].mxu1 }
 0x1f7   :  { %2489 = vtanh.f32 %v568_v57  ;;  %v571_v62 = vadd.f32 %v2204_v61, %v2815_v40  ;;  %v562_v63 = vpop.f32.mrb[27].mxu1  ;;  %2227 = vmatprep.mubr.msk.bf16.mxu0 %vm651_vm2, %v630_v59 }
 0x1f8   :  { %2491 = vtanh.f32 %v560_v60  ;;  %v563_v0 = vadd.f32 %v2815_v40, %v562_v63  ;;  %2228 = vmatmul.mubr.msk.bf16.gmra.mrb[48].mxu0 %vm651_vm2, %v631_v56 }
 0x1f9   :  { %v2482_v1 = vpop.eup %2481  ;;  %2493 = vtanh.f32 %v571_v62 }
 0x1fa   :  { %v2484_v2 = vpop.eup %2483  ;;  %2495 = vtanh.f32 %v563_v0 }
 0x1fb   :  { %v2486_v3 = vpop.eup %2485 }
 0x1fc   :  { %v2488_v4 = vpop.eup %2487  ;;  %v2207_v5 = vpop.f32.mrb[28].mxu1  ;;  %v633_v6 = vpack.c.bf16 %v2486_v3, %v2482_v1 }
 0x1fd   :  { %v584_v7 = vadd.f32 %v2207_v5, %v2815_v40  ;;  %v575_v8 = vpop.f32.mrb[29].mxu1  ;;  %v632_v9 = vpack.c.bf16 %v2488_v4, %v2484_v2 }
 0x1fe   :  { %v576_v10 = vadd.f32 %v2815_v40, %v575_v8  ;;  %v2208_v11 = vpop.f32.mrb[30].mxu1 }
 0x1ff   :  { %2497 = vtanh.f32 %v584_v7  ;;  %v587_v12 = vadd.f32 %v2208_v11, %v2815_v40  ;;  %2231 = vmatprep.mubr.msk.bf16.mxu0 %vm651_vm2, %v632_v9  ;;  %v578_v13 = vpop.f32.mrb[31].mxu1 }
 0x200   :  { %2499 = vtanh.f32 %v576_v10  ;;  %v579_v14 = vadd.f32 %v2815_v40, %v578_v13  ;;  %2232 = vmatmul.mubr.msk.bf16.gmra.mrb[52].mxu0 %vm651_vm2, %v633_v6 }
 0x201   :  { %v2490_v15 = vpop.eup %2489  ;;  %2501 = vtanh.f32 %v587_v12 }
 0x202   :  { %v2492_v16 = vpop.eup %2491  ;;  %2503 = vtanh.f32 %v579_v14 }
 0x203   :  { %v2494_v17 = vpop.eup %2493 }
 0x204   :  { %v2496_v18 = vpop.eup %2495  ;;  %v635_v19 = vpack.c.bf16 %v2494_v17, %v2490_v15 }
 0x205   :  { %v634_v20 = vpack.c.bf16 %v2496_v18, %v2492_v16 }
 0x207   :  { %2235 = vmatprep.mubr.msk.bf16.mxu0 %vm651_vm2, %v634_v20 }
 0x208   :  { %2236 = vmatmul.mubr.msk.bf16.gmra.mrb[56].mxu0 %vm651_vm2, %v635_v19 }
 0x209   :  { %v2498_v21 = vpop.eup %2497 }
 0x20a   :  { %v2500_v22 = vpop.eup %2499 }
 0x20b   :  { %v2502_v23 = vpop.eup %2501 }
 0x20c   :  { %v2504_v24 = vpop.eup %2503  ;;  %v637_v25 = vpack.c.bf16 %v2502_v23, %v2498_v21 }
 0x20d   :  { %v636_v40 = vpack.c.bf16 %v2504_v24, %v2500_v22 }
 0x20f   :  { %2239 = vmatprep.mubr.msk.bf16.mxu0 %vm651_vm2, %v636_v40 }
 0x210   :  { %2240 = vmatmul.mubr.msk.bf16.gmra.mrb[60].mxu0 %vm651_vm2, %v637_v25 }
 0x2ab   :  { %v2213_v29 = vpop.f32.mrb[32].mxu0 }
 0x2ac   :  { %v743_v30 = vadd.f32 %v2213_v29, %v2874_v28  ;;  %v734_v31 = vpop.f32.mrb[33].mxu0 }
 0x2ad   :  { %v735_v32 = vadd.f32 %v2874_v28, %v734_v31  ;;  %v2214_v33 = vpop.f32.mrb[34].mxu0 }
 0x2ae   :  { %2505 = vtanh.f32 %v743_v30  ;;  %v746_v34 = vadd.f32 %v2214_v33, %v2874_v28  ;;  %v737_v35 = vpop.f32.mrb[35].mxu0 }
 0x2af   :  { %2507 = vtanh.f32 %v735_v32  ;;  %v738_v36 = vadd.f32 %v2874_v28, %v737_v35 }
 0x2b0   :  { %2509 = vtanh.f32 %v746_v34 }
 0x2b1   :  { %2511 = vtanh.f32 %v738_v36 }
 0x2b3   :  { %v2217_v37 = vpop.f32.mrb[36].mxu0 }
 0x2b4   :  { %v759_v53 = vadd.f32 %v2217_v37, %v2874_v28  ;;  %v750_v38 = vpop.f32.mrb[37].mxu0 }
 0x2b5   :  { %v751_v39 = vadd.f32 %v2874_v28, %v750_v38  ;;  %v2218_v41 = vpop.f32.mrb[38].mxu0 }
 0x2b6   :  { %2513 = vtanh.f32 %v759_v53  ;;  %v762_v42 = vadd.f32 %v2218_v41, %v2874_v28  ;;  %v753_v43 = vpop.f32.mrb[39].mxu0 }
 0x2b7   :  { %2515 = vtanh.f32 %v751_v39  ;;  %v754_v44 = vadd.f32 %v2874_v28, %v753_v43 }
 0x2b8   :  { %v2506_v45 = vpop.eup %2505  ;;  %2517 = vtanh.f32 %v762_v42 }
 0x2b9   :  { %v2508_v46 = vpop.eup %2507  ;;  %2519 = vtanh.f32 %v754_v44 }
 0x2ba   :  { %v2510_v47 = vpop.eup %2509 }
 0x2bb   :  { %v2512_v48 = vpop.eup %2511  ;;  %v894_v49 = vpack.c.bf16 %v2510_v47, %v2506_v45  ;;  %v2221_v50 = vpop.f32.mrb[40].mxu0 }
 0x2bc   :  { %v775_v51 = vadd.f32 %v2221_v50, %v2874_v28  ;;  %v766_v52 = vpop.f32.mrb[41].mxu0  ;;  %v893_v54 = vpack.c.bf16 %v2512_v48, %v2508_v46 }
 0x2bd   :  { %v767_v55 = vadd.f32 %v2874_v28, %v766_v52  ;;  %v2222_v56 = vpop.f32.mrb[42].mxu0 }
 0x2be   :  { %2521 = vtanh.f32 %v775_v51  ;;  %v778_v57 = vadd.f32 %v2222_v56, %v2874_v28  ;;  %v769_v58 = vpop.f32.mrb[43].mxu0  ;;  %2245 = vmatprep.mubr.msk.bf16.mxu1 %vm921_vm3, %v893_v54 }
 0x2bf   :  { %2523 = vtanh.f32 %v767_v55  ;;  %v770_v59 = vadd.f32 %v2874_v28, %v769_v58  ;;  %2246 = vmatmul.mubr.msk.bf16.vlgmr.msra.gmra.mrb[32].mxu1 %vm921_vm3, %v894_v49 }
 0x2c0   :  { %v2514_v60 = vpop.eup %2513  ;;  %2525 = vtanh.f32 %v778_v57 }
 0x2c1   :  { %v2516_v61 = vpop.eup %2515  ;;  %2527 = vtanh.f32 %v770_v59 }
 0x2c2   :  { %v2518_v62 = vpop.eup %2517 }
 0x2c3   :  { %v2520_v63 = vpop.eup %2519  ;;  %v2225_v0 = vpop.f32.mrb[44].mxu0  ;;  %v896_v1 = vpack.c.bf16 %v2518_v62, %v2514_v60 }
 0x2c4   :  { %v791_v2 = vadd.f32 %v2225_v0, %v2874_v28  ;;  %v782_v3 = vpop.f32.mrb[45].mxu0  ;;  %v895_v4 = vpack.c.bf16 %v2520_v63, %v2516_v61 }
 0x2c5   :  { %v783_v5 = vadd.f32 %v2874_v28, %v782_v3  ;;  %v2226_v6 = vpop.f32.mrb[46].mxu0 }
 0x2c6   :  { %2529 = vtanh.f32 %v791_v2  ;;  %v794_v7 = vadd.f32 %v2226_v6, %v2874_v28  ;;  %v785_v8 = vpop.f32.mrb[47].mxu0  ;;  %2249 = vmatprep.mubr.msk.bf16.mxu1 %vm921_vm3, %v895_v4 }
 0x2c7   :  { %2531 = vtanh.f32 %v783_v5  ;;  %v786_v9 = vadd.f32 %v2874_v28, %v785_v8  ;;  %2250 = vmatmul.mubr.msk.bf16.gmra.mrb[36].mxu1 %vm921_vm3, %v896_v1 }
 0x2c8   :  { %v2522_v10 = vpop.eup %2521  ;;  %2533 = vtanh.f32 %v794_v7 }
 0x2c9   :  { %v2524_v11 = vpop.eup %2523  ;;  %2535 = vtanh.f32 %v786_v9 }
 0x2ca   :  { %v2526_v12 = vpop.eup %2525 }
 0x2cb   :  { %v2528_v13 = vpop.eup %2527  ;;  %v2229_v14 = vpop.f32.mrb[48].mxu0  ;;  %v898_v15 = vpack.c.bf16 %v2526_v12, %v2522_v10 }
 0x2cc   :  { %v807_v16 = vadd.f32 %v2229_v14, %v2874_v28  ;;  %v798_v17 = vpop.f32.mrb[49].mxu0  ;;  %v897_v18 = vpack.c.bf16 %v2528_v13, %v2524_v11  ;;  %v2373_v14 = vld [vmem:[%s3141_s6] sm:$0xff]  }
 0x2cd   :  { %v799_v19 = vadd.f32 %v2874_v28, %v798_v17  ;;  %v2230_v20 = vpop.f32.mrb[50].mxu0  ;;  %2313 = vmatprep.subr.bf16.mxu1 %v2373_v14  ;;  %v2376_v17 = vld [vmem:[%s3141_s6 + $0x18] sm:$0xff]  }
 0x2ce   :  { %2537 = vtanh.f32 %v807_v16  ;;  %v810_v21 = vadd.f32 %v2230_v20, %v2874_v28  ;;  %v801_v22 = vpop.f32.mrb[51].mxu0  ;;  %2253 = vmatprep.mubr.msk.bf16.mxu1 %vm921_vm3, %v897_v18  ;;  %2314 = vmatpush3.bf16.msra.mxu1 %v2373_v14  ;;  %v2375_v16 = vld [vmem:[%s3141_s6 + $0x10] sm:$0xff]   ;;  %v2939_v18 = vld [vmem:[%s3138_s8 + $0x3] ss:$0 sm:$0xff] }
 0x2cf   :  { %2539 = vtanh.f32 %v799_v19  ;;  %v802_v23 = vadd.f32 %v2874_v28, %v801_v22  ;;  %2254 = vmatmul.mubr.msk.bf16.gmra.mrb[40].mxu1 %vm921_vm3, %v898_v15  ;;  %v2374_v15 = vld [vmem:[%s3141_s6 + $0x8] sm:$0xff]  }
 0x2d0   :  { %v2530_v24 = vpop.eup %2529  ;;  %2541 = vtanh.f32 %v810_v21  ;;  %2315 = vmatprep.subr.bf16.mxu1 %v2374_v15 }
 0x2d1   :  { %v2532_v25 = vpop.eup %2531  ;;  %2543 = vtanh.f32 %v802_v23 }
 0x2d2   :  { %v2534_v40 = vpop.eup %2533  ;;  %2316 = vmatpush3.bf16.msra.mxu1 %v2374_v15 }
 0x2d3   :  { %v2536_v26 = vpop.eup %2535  ;;  %v2233_v27 = vpop.f32.mrb[52].mxu0  ;;  %v900_v29 = vpack.c.bf16 %v2534_v40, %v2530_v24  ;;  %2317 = vmatprep.subr.bf16.mxu1 %v2375_v16 }
 0x2d4   :  { %v823_v30 = vadd.f32 %v2233_v27, %v2874_v28  ;;  %v814_v31 = vpop.f32.mrb[53].mxu0  ;;  %v899_v32 = vpack.c.bf16 %v2536_v26, %v2532_v25 }
 0x2d5   :  { %v815_v33 = vadd.f32 %v2874_v28, %v814_v31  ;;  %v2234_v34 = vpop.f32.mrb[54].mxu0 }
 0x2d6   :  { %2545 = vtanh.f32 %v823_v30  ;;  %v826_v35 = vadd.f32 %v2234_v34, %v2874_v28  ;;  %v817_v36 = vpop.f32.mrb[55].mxu0  ;;  %2257 = vmatprep.mubr.msk.bf16.mxu1 %vm921_vm3, %v899_v32  ;;  %2318 = vmatpush3.bf16.msra.mxu1 %v2375_v16 }
 0x2d7   :  { %2547 = vtanh.f32 %v815_v33  ;;  %v818_v37 = vadd.f32 %v2874_v28, %v817_v36  ;;  %2258 = vmatmul.mubr.msk.bf16.gmra.mrb[44].mxu1 %vm921_vm3, %v900_v29  ;;  %2319 = vmatprep.subr.bf16.mxu1 %v2376_v17 }
 0x2d8   :  { %v2538_v53 = vpop.eup %2537  ;;  %2549 = vtanh.f32 %v826_v35 }
 0x2d9   :  { %v2540_v38 = vpop.eup %2539  ;;  %2551 = vtanh.f32 %v818_v37 }
 0x2da   :  { %v2542_v39 = vpop.eup %2541  ;;  %2320 = vmatpush3.bf16.msra.mxu1 %v2376_v17 }
 0x2db   :  { %v2544_v41 = vpop.eup %2543  ;;  %v2237_v42 = vpop.f32.mrb[56].mxu0  ;;  %v902_v43 = vpack.c.bf16 %v2542_v39, %v2538_v53 }
 0x2dc   :  { %v839_v44 = vadd.f32 %v2237_v42, %v2874_v28  ;;  %v830_v45 = vpop.f32.mrb[57].mxu0  ;;  %v901_v46 = vpack.c.bf16 %v2544_v41, %v2540_v38 }
 0x2dd   :  { %v831_v47 = vadd.f32 %v2874_v28, %v830_v45  ;;  %v2238_v48 = vpop.f32.mrb[58].mxu0 }
 0x2de   :  { %2553 = vtanh.f32 %v839_v44  ;;  %v842_v49 = vadd.f32 %v2238_v48, %v2874_v28  ;;  %v833_v50 = vpop.f32.mrb[59].mxu0  ;;  %2261 = vmatprep.mubr.msk.bf16.mxu1 %vm921_vm3, %v901_v46 }
 0x2df   :  { %2555 = vtanh.f32 %v831_v47  ;;  %v834_v51 = vadd.f32 %v2874_v28, %v833_v50  ;;  %2262 = vmatmul.mubr.msk.bf16.gmra.mrb[48].mxu1 %vm921_vm3, %v902_v43 }
 0x2e0   :  { %v2546_v52 = vpop.eup %2545  ;;  %2557 = vtanh.f32 %v842_v49 }
 0x2e1   :  { %v2548_v54 = vpop.eup %2547  ;;  %2559 = vtanh.f32 %v834_v51 }
 0x2e2   :  { %v2550_v55 = vpop.eup %2549 }
 0x2e3   :  { %v2552_v56 = vpop.eup %2551  ;;  %v2241_v57 = vpop.f32.mrb[60].mxu0  ;;  %v904_v58 = vpack.c.bf16 %v2550_v55, %v2546_v52 }
 0x2e4   :  { %v855_v59 = vadd.f32 %v2241_v57, %v2874_v28  ;;  %v846_v60 = vpop.f32.mrb[61].mxu0  ;;  %v903_v61 = vpack.c.bf16 %v2552_v56, %v2548_v54 }
 0x2e5   :  { %v847_v62 = vadd.f32 %v2874_v28, %v846_v60  ;;  %v2242_v63 = vpop.f32.mrb[62].mxu0 }
 0x2e6   :  { %2561 = vtanh.f32 %v855_v59  ;;  %v858_v0 = vadd.f32 %v2242_v63, %v2874_v28  ;;  %2265 = vmatprep.mubr.msk.bf16.mxu1 %vm921_vm3, %v903_v61  ;;  %v849_v1 = vpop.f32.mrb[63].mxu0 }
 0x2e7   :  { %2563 = vtanh.f32 %v847_v62  ;;  %v850_v2 = vadd.f32 %v2874_v28, %v849_v1  ;;  %2266 = vmatmul.mubr.msk.bf16.gmra.mrb[52].mxu1 %vm921_vm3, %v904_v58 }
 0x2e8   :  { %v2554_v3 = vpop.eup %2553  ;;  %2565 = vtanh.f32 %v858_v0 }
 0x2e9   :  { %v2556_v4 = vpop.eup %2555  ;;  %2567 = vtanh.f32 %v850_v2 }
 0x2ea   :  { %v2558_v5 = vpop.eup %2557 }
 0x2eb   :  { %v2560_v6 = vpop.eup %2559  ;;  %v906_v7 = vpack.c.bf16 %v2558_v5, %v2554_v3 }
 0x2ec   :  { %v905_v8 = vpack.c.bf16 %v2560_v6, %v2556_v4 }
 0x2ee   :  { %2269 = vmatprep.mubr.msk.bf16.mxu1 %vm921_vm3, %v905_v8 }
 0x2ef   :  { %2270 = vmatmul.mubr.msk.bf16.gmra.mrb[56].mxu1 %vm921_vm3, %v906_v7 }
 0x2f0   :  { %v2562_v9 = vpop.eup %2561 }
 0x2f1   :  { %v2564_v10 = vpop.eup %2563 }
 0x2f2   :  { %v2566_v11 = vpop.eup %2565 }
 0x2f3   :  { %v2568_v12 = vpop.eup %2567  ;;  %v908_v13 = vpack.c.bf16 %v2566_v11, %v2562_v9 }
 0x2f4   :  { %v907_v28 = vpack.c.bf16 %v2568_v12, %v2564_v10 }
 0x2f6   :  { %2273 = vmatprep.mubr.msk.bf16.mxu1 %vm921_vm3, %v907_v28 }
 0x2f7   :  { %2274 = vmatmul.mubr.msk.bf16.gmra.mrb[60].mxu1 %vm921_vm3, %v908_v13 }
 0x392   :  { %v2247_v19 = vpop.f32.mrb[32].mxu1 }
 0x393   :  { %v1017_v20 = vadd.f32 %v2247_v19, %v2939_v18  ;;  %v1008_v21 = vpop.f32.mrb[33].mxu1 }
 0x394   :  { %v1009_v22 = vadd.f32 %v2939_v18, %v1008_v21  ;;  %v2248_v23 = vpop.f32.mrb[34].mxu1 }
 0x395   :  { %v1020_v24 = vadd.f32 %v2248_v23, %v2939_v18  ;;  %v1011_v25 = vpop.f32.mrb[35].mxu1  ;;  %v1137_v26 = vmax.f32 %v1017_v20, 0.0 }
 0x396   :  { %v1012_v40 = vadd.f32 %v2939_v18, %v1011_v25  ;;  %v1135_v29 = vmax.f32 %v1009_v22, 0.0 }
 0x397   :  { %v1138_v27 = vmax.f32 %v1020_v24, 0.0 }
 0x398   :  { %v1136_v30 = vmax.f32 %v1012_v40, 0.0 }
 0x399   :  { %v1168_v31 = vpack.c.bf16 %v1138_v27, %v1137_v26 }
 0x39a   :  { %v1167_v32 = vpack.c.bf16 %v1136_v30, %v1135_v29  ;;  %v2251_v33 = vpop.f32.mrb[36].mxu1 }
 0x39b   :  { %v1033_v34 = vadd.f32 %v2251_v33, %v2939_v18  ;;  %v1024_v35 = vpop.f32.mrb[37].mxu1 }
 0x39c   :  { %v1025_v36 = vadd.f32 %v2939_v18, %v1024_v35  ;;  %v2252_v37 = vpop.f32.mrb[38].mxu1  ;;  %2281 = vmatprep.mubr.msk.bf16.mxu0 %vm102_vm0, %v1167_v32 }
 0x39d   :  { %v1036_v53 = vadd.f32 %v2252_v37, %v2939_v18  ;;  %v1027_v38 = vpop.f32.mrb[39].mxu1  ;;  %2282 = vmatmul.mubr.msk.bf16.vlgmr.msra.gmra.mrb[64].mxu0 %vm102_vm0, %v1168_v31  ;;  %v1141_v41 = vmax.f32 %v1033_v34, 0.0 }
 0x39e   :  { %v1028_v39 = vadd.f32 %v2939_v18, %v1027_v38  ;;  %v1139_v43 = vmax.f32 %v1025_v36, 0.0 }
 0x39f   :  { %v1142_v42 = vmax.f32 %v1036_v53, 0.0 }
 0x3a0   :  { %v1140_v44 = vmax.f32 %v1028_v39, 0.0 }
 0x3a1   :  { %v1170_v45 = vpack.c.bf16 %v1142_v42, %v1141_v41 }
 0x3a2   :  { %v1169_v46 = vpack.c.bf16 %v1140_v44, %v1139_v43  ;;  %v2255_v47 = vpop.f32.mrb[40].mxu1 }
 0x3a3   :  { %v1049_v48 = vadd.f32 %v2255_v47, %v2939_v18  ;;  %v1040_v49 = vpop.f32.mrb[41].mxu1 }
 0x3a4   :  { %v1041_v50 = vadd.f32 %v2939_v18, %v1040_v49  ;;  %v2256_v51 = vpop.f32.mrb[42].mxu1  ;;  %2285 = vmatprep.mubr.msk.bf16.mxu0 %vm102_vm0, %v1169_v46 }
 0x3a5   :  { %v1052_v52 = vadd.f32 %v2256_v51, %v2939_v18  ;;  %v1043_v54 = vpop.f32.mrb[43].mxu1  ;;  %2286 = vmatmul.mubr.msk.bf16.gmra.mrb[68].mxu0 %vm102_vm0, %v1170_v45  ;;  %v1145_v56 = vmax.f32 %v1049_v48, 0.0 }
 0x3a6   :  { %v1044_v55 = vadd.f32 %v2939_v18, %v1043_v54  ;;  %v1143_v58 = vmax.f32 %v1041_v50, 0.0 }
 0x3a7   :  { %v1146_v57 = vmax.f32 %v1052_v52, 0.0 }
 0x3a8   :  { %v1144_v59 = vmax.f32 %v1044_v55, 0.0 }
 0x3a9   :  { %v1172_v60 = vpack.c.bf16 %v1146_v57, %v1145_v56 }
 0x3aa   :  { %v1171_v61 = vpack.c.bf16 %v1144_v59, %v1143_v58  ;;  %v2259_v62 = vpop.f32.mrb[44].mxu1 }
 0x3ab   :  { %v1065_v63 = vadd.f32 %v2259_v62, %v2939_v18  ;;  %v1056_v0 = vpop.f32.mrb[45].mxu1 }
 0x3ac   :  { %v1057_v1 = vadd.f32 %v2939_v18, %v1056_v0  ;;  %v2260_v2 = vpop.f32.mrb[46].mxu1  ;;  %2289 = vmatprep.mubr.msk.bf16.mxu0 %vm102_vm0, %v1171_v61 }
 0x3ad   :  { %v1068_v3 = vadd.f32 %v2260_v2, %v2939_v18  ;;  %v1059_v4 = vpop.f32.mrb[47].mxu1  ;;  %2290 = vmatmul.mubr.msk.bf16.gmra.mrb[72].mxu0 %vm102_vm0, %v1172_v60  ;;  %v1149_v6 = vmax.f32 %v1065_v63, 0.0 }
 0x3ae   :  { %v1060_v5 = vadd.f32 %v2939_v18, %v1059_v4  ;;  %v1147_v8 = vmax.f32 %v1057_v1, 0.0 }
 0x3af   :  { %v1150_v7 = vmax.f32 %v1068_v3, 0.0 }
 0x3b0   :  { %v1148_v9 = vmax.f32 %v1060_v5, 0.0  ;;  %v2992_v5 = vld [vmem:[%s3138_s8 + $0x4] ss:$0 sm:$0xff] }
 0x3b1   :  { %v1174_v10 = vpack.c.bf16 %v1150_v7, %v1149_v6 }
 0x3b2   :  { %v1173_v11 = vpack.c.bf16 %v1148_v9, %v1147_v8  ;;  %v2263_v12 = vpop.f32.mrb[48].mxu1 }
 0x3b3   :  { %v1081_v13 = vadd.f32 %v2263_v12, %v2939_v18  ;;  %v1072_v28 = vpop.f32.mrb[49].mxu1 }
 0x3b4   :  { %v1073_v14 = vadd.f32 %v2939_v18, %v1072_v28  ;;  %v2264_v15 = vpop.f32.mrb[50].mxu1  ;;  %2293 = vmatprep.mubr.msk.bf16.mxu0 %vm102_vm0, %v1173_v11 }
 0x3b5   :  { %v1084_v16 = vadd.f32 %v2264_v15, %v2939_v18  ;;  %v1075_v17 = vpop.f32.mrb[51].mxu1  ;;  %2294 = vmatmul.mubr.msk.bf16.gmra.mrb[76].mxu0 %vm102_vm0, %v1174_v10  ;;  %v1153_v20 = vmax.f32 %v1081_v13, 0.0 }
 0x3b6   :  { %v1076_v19 = vadd.f32 %v2939_v18, %v1075_v17  ;;  %v1151_v22 = vmax.f32 %v1073_v14, 0.0 }
 0x3b7   :  { %v1154_v21 = vmax.f32 %v1084_v16, 0.0 }
 0x3b8   :  { %v1152_v23 = vmax.f32 %v1076_v19, 0.0 }
 0x3b9   :  { %v1176_v24 = vpack.c.bf16 %v1154_v21, %v1153_v20 }
 0x3ba   :  { %v1175_v25 = vpack.c.bf16 %v1152_v23, %v1151_v22  ;;  %v2267_v40 = vpop.f32.mrb[52].mxu1 }
 0x3bb   :  { %v1097_v26 = vadd.f32 %v2267_v40, %v2939_v18  ;;  %v1088_v27 = vpop.f32.mrb[53].mxu1 }
 0x3bc   :  { %v1089_v29 = vadd.f32 %v2939_v18, %v1088_v27  ;;  %v2268_v30 = vpop.f32.mrb[54].mxu1  ;;  %2297 = vmatprep.mubr.msk.bf16.mxu0 %vm102_vm0, %v1175_v25 }
 0x3bd   :  { %v1100_v31 = vadd.f32 %v2268_v30, %v2939_v18  ;;  %v1091_v32 = vpop.f32.mrb[55].mxu1  ;;  %2298 = vmatmul.mubr.msk.bf16.gmra.mrb[80].mxu0 %vm102_vm0, %v1176_v24  ;;  %v1157_v34 = vmax.f32 %v1097_v26, 0.0 }
 0x3be   :  { %v1092_v33 = vadd.f32 %v2939_v18, %v1091_v32  ;;  %v1155_v36 = vmax.f32 %v1089_v29, 0.0 }
 0x3bf   :  { %v1158_v35 = vmax.f32 %v1100_v31, 0.0 }
 0x3c0   :  { %v1156_v37 = vmax.f32 %v1092_v33, 0.0 }
 0x3c1   :  { %v1178_v53 = vpack.c.bf16 %v1158_v35, %v1157_v34 }
 0x3c2   :  { %v1177_v38 = vpack.c.bf16 %v1156_v37, %v1155_v36  ;;  %v2271_v39 = vpop.f32.mrb[56].mxu1 }
 0x3c3   :  { %v1113_v41 = vadd.f32 %v2271_v39, %v2939_v18  ;;  %v1104_v42 = vpop.f32.mrb[57].mxu1 }
 0x3c4   :  { %v1105_v43 = vadd.f32 %v2939_v18, %v1104_v42  ;;  %v2272_v44 = vpop.f32.mrb[58].mxu1  ;;  %2301 = vmatprep.mubr.msk.bf16.mxu0 %vm102_vm0, %v1177_v38 }
 0x3c5   :  { %v1161_v45 = vmax.f32 %v1113_v41, 0.0  ;;  %v1116_v46 = vadd.f32 %v2272_v44, %v2939_v18  ;;  %v1107_v47 = vpop.f32.mrb[59].mxu1  ;;  %2302 = vmatmul.mubr.msk.bf16.gmra.mrb[84].mxu0 %vm102_vm0, %v1178_v53 }
 0x3c6   :  { %v1159_v48 = vmax.f32 %v1105_v43, 0.0  ;;  %v1108_v49 = vadd.f32 %v2939_v18, %v1107_v47 }
 0x3c7   :  { %v1162_v50 = vmax.f32 %v1116_v46, 0.0 }
 0x3c8   :  { %v1160_v51 = vmax.f32 %v1108_v49, 0.0 }
 0x3c9   :  { %v1180_v52 = vpack.c.bf16 %v1162_v50, %v1161_v45 }
 0x3ca   :  { %v1179_v54 = vpack.c.bf16 %v1160_v51, %v1159_v48  ;;  %v2275_v55 = vpop.f32.mrb[60].mxu1 }
 0x3cb   :  { %v1129_v56 = vadd.f32 %v2275_v55, %v2939_v18  ;;  %v1120_v57 = vpop.f32.mrb[61].mxu1 }
 0x3cc   :  { %v1121_v58 = vadd.f32 %v2939_v18, %v1120_v57  ;;  %2305 = vmatprep.mubr.msk.bf16.mxu0 %vm102_vm0, %v1179_v54  ;;  %v2276_v59 = vpop.f32.mrb[62].mxu1 }
 0x3cd   :  { %v1165_v60 = vmax.f32 %v1129_v56, 0.0  ;;  %v1132_v61 = vadd.f32 %v2276_v59, %v2939_v18  ;;  %2306 = vmatmul.mubr.msk.bf16.gmra.mrb[88].mxu0 %vm102_vm0, %v1180_v52  ;;  %v1123_v62 = vpop.f32.mrb[63].mxu1 }
 0x3ce   :  { %v1163_v63 = vmax.f32 %v1121_v58, 0.0  ;;  %v1124_v0 = vadd.f32 %v2939_v18, %v1123_v62 }
 0x3cf   :  { %v1166_v1 = vmax.f32 %v1132_v61, 0.0 }
 0x3d0   :  { %v1164_v2 = vmax.f32 %v1124_v0, 0.0 }
 0x3d1   :  { %v1182_v3 = vpack.c.bf16 %v1166_v1, %v1165_v60 }
 0x3d2   :  { %v1181_v4 = vpack.c.bf16 %v1164_v2, %v1163_v63 }
 0x3d4   :  { %2309 = vmatprep.mubr.msk.bf16.mxu0 %vm102_vm0, %v1181_v4 }
 0x3d5   :  { %2310 = vmatmul.mubr.msk.bf16.gmra.mrb[92].mxu0 %vm102_vm0, %v1182_v3 }
 0x470   :  { %v2283_v6 = vpop.f32.mrb[64].mxu0 }
 0x471   :  { %v1295_v7 = vadd.f32 %v2283_v6, %v2992_v5  ;;  %v1286_v8 = vpop.f32.mrb[65].mxu0 }
 0x472   :  { %v1287_v9 = vadd.f32 %v2992_v5, %v1286_v8  ;;  %v2284_v18 = vpop.f32.mrb[66].mxu0 }
 0x473   :  { %v1298_v10 = vadd.f32 %v2284_v18, %v2992_v5  ;;  %v1289_v11 = vpop.f32.mrb[67].mxu0  ;;  %v1415_v13 = vmax.f32 %v1295_v7, 0.0 }
 0x474   :  { %v1290_v12 = vadd.f32 %v2992_v5, %v1289_v11  ;;  %v1413_v14 = vmax.f32 %v1287_v9, 0.0 }
 0x475   :  { %v1416_v28 = vmax.f32 %v1298_v10, 0.0 }
 0x476   :  { %v1414_v15 = vmax.f32 %v1290_v12, 0.0 }
 0x477   :  { %v1446_v16 = vpack.c.bf16 %v1416_v28, %v1415_v13 }
 0x478   :  { %v1445_v17 = vpack.c.bf16 %v1414_v15, %v1413_v14  ;;  %v2287_v19 = vpop.f32.mrb[68].mxu0 }
 0x479   :  { %v1311_v20 = vadd.f32 %v2287_v19, %v2992_v5  ;;  %v1302_v21 = vpop.f32.mrb[69].mxu0 }
 0x47a   :  { %v1303_v22 = vadd.f32 %v2992_v5, %v1302_v21  ;;  %v2288_v23 = vpop.f32.mrb[70].mxu0  ;;  %2321 = vmatprep.mubr.msk.bf16.mxu1 %vm1498_vm4, %v1445_v17 }
 0x47b   :  { %v1314_v24 = vadd.f32 %v2288_v23, %v2992_v5  ;;  %v1305_v25 = vpop.f32.mrb[71].mxu0  ;;  %2322 = vmatmul.mubr.msk.bf16.vlgmr.msra.gmra.mrb[64].mxu1 %vm1498_vm4, %v1446_v16  ;;  %v1419_v26 = vmax.f32 %v1311_v20, 0.0 }
 0x47c   :  { %v1306_v40 = vadd.f32 %v2992_v5, %v1305_v25  ;;  %v1417_v29 = vmax.f32 %v1303_v22, 0.0 }
 0x47d   :  { %v1420_v27 = vmax.f32 %v1314_v24, 0.0 }
 0x47e   :  { %v1418_v30 = vmax.f32 %v1306_v40, 0.0 }
 0x47f   :  { %v1448_v31 = vpack.c.bf16 %v1420_v27, %v1419_v26 }
 0x480   :  { %v1447_v32 = vpack.c.bf16 %v1418_v30, %v1417_v29  ;;  %v2291_v33 = vpop.f32.mrb[72].mxu0 }
 0x481   :  { %v1327_v34 = vadd.f32 %v2291_v33, %v2992_v5  ;;  %v1318_v35 = vpop.f32.mrb[73].mxu0 }
 0x482   :  { %v1319_v36 = vadd.f32 %v2992_v5, %v1318_v35  ;;  %v2292_v37 = vpop.f32.mrb[74].mxu0  ;;  %2325 = vmatprep.mubr.msk.bf16.mxu1 %vm1498_vm4, %v1447_v32 }
 0x483   :  { %v1330_v53 = vadd.f32 %v2292_v37, %v2992_v5  ;;  %v1321_v38 = vpop.f32.mrb[75].mxu0  ;;  %2326 = vmatmul.mubr.msk.bf16.gmra.mrb[68].mxu1 %vm1498_vm4, %v1448_v31  ;;  %v1423_v41 = vmax.f32 %v1327_v34, 0.0 }
 0x484   :  { %v1322_v39 = vadd.f32 %v2992_v5, %v1321_v38  ;;  %v1421_v43 = vmax.f32 %v1319_v36, 0.0 }
 0x485   :  { %v1424_v42 = vmax.f32 %v1330_v53, 0.0 }
 0x486   :  { %v1422_v44 = vmax.f32 %v1322_v39, 0.0 }
 0x487   :  { %v1450_v45 = vpack.c.bf16 %v1424_v42, %v1423_v41 }
 0x488   :  { %v1449_v46 = vpack.c.bf16 %v1422_v44, %v1421_v43  ;;  %v2295_v47 = vpop.f32.mrb[76].mxu0 }
 0x489   :  { %v1343_v48 = vadd.f32 %v2295_v47, %v2992_v5  ;;  %v1334_v49 = vpop.f32.mrb[77].mxu0 }
 0x48a   :  { %v1335_v50 = vadd.f32 %v2992_v5, %v1334_v49  ;;  %v2296_v51 = vpop.f32.mrb[78].mxu0  ;;  %2329 = vmatprep.mubr.msk.bf16.mxu1 %vm1498_vm4, %v1449_v46 }
 0x48b   :  { %v1346_v52 = vadd.f32 %v2296_v51, %v2992_v5  ;;  %v1337_v54 = vpop.f32.mrb[79].mxu0  ;;  %2330 = vmatmul.mubr.msk.bf16.gmra.mrb[72].mxu1 %vm1498_vm4, %v1450_v45  ;;  %v1427_v56 = vmax.f32 %v1343_v48, 0.0 }
 0x48c   :  { %v1338_v55 = vadd.f32 %v2992_v5, %v1337_v54  ;;  %v1425_v58 = vmax.f32 %v1335_v50, 0.0 }
 0x48d   :  { %v1428_v57 = vmax.f32 %v1346_v52, 0.0 }
 0x48e   :  { %v1426_v59 = vmax.f32 %v1338_v55, 0.0  ;;  %v3045_v55 = vld [vmem:[%s3142_s7] sm:$0x1] }
 0x48f   :  { %v1452_v60 = vpack.c.bf16 %v1428_v57, %v1427_v56  ;;  %2135 = vmatprep.mubr.msk.bf16.mxu0 %vm102_vm0, %v3045_v55  ;;  %v2577_v56 = vmov 0   ;;  %v3055_v57 = vld [vmem:[%s3138_s8 + $0x5] ss:$0 sm:$0xff] }
 0x490   :  { %v1451_v61 = vpack.c.bf16 %v1426_v59, %v1425_v58  ;;  %v2299_v62 = vpop.f32.mrb[80].mxu0  ;;  %2364 = vset.pattern.permute.xlu0 %v2577_v56 }
 0x491   :  { %v1359_v63 = vadd.f32 %v2299_v62, %v2992_v5  ;;  %v1350_v0 = vpop.f32.mrb[81].mxu0 }
 0x492   :  { %v1351_v1 = vadd.f32 %v2992_v5, %v1350_v0  ;;  %v2300_v2 = vpop.f32.mrb[82].mxu0  ;;  %2333 = vmatprep.mubr.msk.bf16.mxu1 %vm1498_vm4, %v1451_v61 }
 0x493   :  { %v1362_v3 = vadd.f32 %v2300_v2, %v2992_v5  ;;  %v1353_v4 = vpop.f32.mrb[83].mxu0  ;;  %2334 = vmatmul.mubr.msk.bf16.gmra.mrb[76].mxu1 %vm1498_vm4, %v1452_v60  ;;  %v1431_v7 = vmax.f32 %v1359_v63, 0.0 }
 0x494   :  { %v1354_v6 = vadd.f32 %v2992_v5, %v1353_v4  ;;  %v1429_v9 = vmax.f32 %v1351_v1, 0.0 }
 0x495   :  { %v1432_v8 = vmax.f32 %v1362_v3, 0.0 }
 0x496   :  { %v1430_v18 = vmax.f32 %v1354_v6, 0.0 }
 0x497   :  { %v1454_v10 = vpack.c.bf16 %v1432_v8, %v1431_v7 }
 0x498   :  { %v1453_v11 = vpack.c.bf16 %v1430_v18, %v1429_v9  ;;  %v2303_v12 = vpop.f32.mrb[84].mxu0 }
 0x499   :  { %v1375_v13 = vadd.f32 %v2303_v12, %v2992_v5  ;;  %v1366_v28 = vpop.f32.mrb[85].mxu0 }
 0x49a   :  { %v1367_v14 = vadd.f32 %v2992_v5, %v1366_v28  ;;  %v2304_v15 = vpop.f32.mrb[86].mxu0  ;;  %2337 = vmatprep.mubr.msk.bf16.mxu1 %vm1498_vm4, %v1453_v11 }
 0x49b   :  { %v1378_v16 = vadd.f32 %v2304_v15, %v2992_v5  ;;  %v1369_v17 = vpop.f32.mrb[87].mxu0  ;;  %2338 = vmatmul.mubr.msk.bf16.gmra.mrb[80].mxu1 %vm1498_vm4, %v1454_v10  ;;  %v1435_v20 = vmax.f32 %v1375_v13, 0.0 }
 0x49c   :  { %v1370_v19 = vadd.f32 %v2992_v5, %v1369_v17  ;;  %v1433_v22 = vmax.f32 %v1367_v14, 0.0 }
 0x49d   :  { %v1436_v21 = vmax.f32 %v1378_v16, 0.0 }
 0x49e   :  { %v1434_v23 = vmax.f32 %v1370_v19, 0.0 }
 0x49f   :  { %v1456_v24 = vpack.c.bf16 %v1436_v21, %v1435_v20 }
 0x4a0   :  { %v1455_v25 = vpack.c.bf16 %v1434_v23, %v1433_v22  ;;  %v2307_v40 = vpop.f32.mrb[88].mxu0 }
 0x4a1   :  { %v1391_v26 = vadd.f32 %v2307_v40, %v2992_v5  ;;  %v1382_v27 = vpop.f32.mrb[89].mxu0 }
 0x4a2   :  { %v1383_v29 = vadd.f32 %v2992_v5, %v1382_v27  ;;  %v2308_v30 = vpop.f32.mrb[90].mxu0  ;;  %2341 = vmatprep.mubr.msk.bf16.mxu1 %vm1498_vm4, %v1455_v25 }
 0x4a3   :  { %v1394_v31 = vadd.f32 %v2308_v30, %v2992_v5  ;;  %v1385_v32 = vpop.f32.mrb[91].mxu0  ;;  %2342 = vmatmul.mubr.msk.bf16.gmra.mrb[84].mxu1 %vm1498_vm4, %v1456_v24  ;;  %v1439_v34 = vmax.f32 %v1391_v26, 0.0 }
 0x4a4   :  { %v1386_v33 = vadd.f32 %v2992_v5, %v1385_v32  ;;  %v1437_v36 = vmax.f32 %v1383_v29, 0.0 }
 0x4a5   :  { %v1440_v35 = vmax.f32 %v1394_v31, 0.0 }
 0x4a6   :  { %v1438_v37 = vmax.f32 %v1386_v33, 0.0 }
 0x4a7   :  { %v1458_v53 = vpack.c.bf16 %v1440_v35, %v1439_v34 }
 0x4a8   :  { %v1457_v38 = vpack.c.bf16 %v1438_v37, %v1437_v36  ;;  %v2311_v39 = vpop.f32.mrb[92].mxu0 }
 0x4a9   :  { %v1407_v41 = vadd.f32 %v2311_v39, %v2992_v5  ;;  %v1398_v42 = vpop.f32.mrb[93].mxu0 }
 0x4aa   :  { %v1399_v43 = vadd.f32 %v2992_v5, %v1398_v42  ;;  %2345 = vmatprep.mubr.msk.bf16.mxu1 %vm1498_vm4, %v1457_v38  ;;  %v2312_v44 = vpop.f32.mrb[94].mxu0 }
 0x4ab   :  { %v1443_v45 = vmax.f32 %v1407_v41, 0.0  ;;  %v1410_v46 = vadd.f32 %v2312_v44, %v2992_v5  ;;  %2346 = vmatmul.mubr.msk.bf16.gmra.mrb[88].mxu1 %vm1498_vm4, %v1458_v53  ;;  %v1401_v47 = vpop.f32.mrb[95].mxu0 }
 0x4ac   :  { %v1441_v48 = vmax.f32 %v1399_v43, 0.0  ;;  %v1402_v49 = vadd.f32 %v2992_v5, %v1401_v47  ;;  %v1757_v5 = vld [vmem:[%s3138_s8 + $0x6] sm:$0x1] }
 0x4ad   :  { %v1444_v50 = vmax.f32 %v1410_v46, 0.0  ;;  %1760 = vperm.xlu0 %2364, %v1757_v5  }
 0x4ae   :  { %v1442_v51 = vmax.f32 %v1402_v49, 0.0 }
 0x4af   :  { %v1460_v52 = vpack.c.bf16 %v1444_v50, %v1443_v45 }
 0x4b0   :  { %v1459_v54 = vpack.c.bf16 %v1442_v51, %v1441_v48 }
 0x4b2   :  { %2349 = vmatprep.mubr.msk.bf16.mxu1 %vm1498_vm4, %v1459_v54 }
 0x4b3   :  { %2350 = vmatmul.mubr.msk.bf16.gmra.mrb[92].mxu1 %vm1498_vm4, %v1460_v52 }
 0x54e   :  { %v2323_v58 = vpop.f32.mrb[64].mxu1 }
 0x54f   :  { %v1590_v59 = vadd.f32 %v2323_v58, %v3055_v57  ;;  %v1581_v60 = vpop.f32.mrb[65].mxu1 }
 0x550   :  { %v1582_v61 = vadd.f32 %v3055_v57, %v1581_v60  ;;  %v2324_v62 = vpop.f32.mrb[66].mxu1 }
 0x551   :  { %v1593_v63 = vadd.f32 %v2324_v62, %v3055_v57  ;;  %v1584_v0 = vpop.f32.mrb[67].mxu1  ;;  %v1710_v2 = vmax.f32 %v1590_v59, 0.0 }
 0x552   :  { %v1585_v1 = vadd.f32 %v3055_v57, %v1584_v0  ;;  %v1708_v4 = vmax.f32 %v1582_v61, 0.0 }
 0x553   :  { %v1711_v3 = vmax.f32 %v1593_v63, 0.0 }
 0x554   :  { %v1709_v6 = vmax.f32 %v1585_v1, 0.0 }
 0x555   :  { %v3061_v7 = vpack.c.bf16 %v1711_v3, %v1710_v2 }
 0x556   :  { %v3063_v8 = vpack.c.bf16 %v1709_v6, %v1708_v4  ;;  %v2327_v9 = vpop.f32.mrb[68].mxu1 }
 0x557   :  { %v1606_v18 = vadd.f32 %v2327_v9, %v3055_v57  ;;  %v1597_v10 = vpop.f32.mrb[69].mxu1 }
 0x558   :  { %v1598_v11 = vadd.f32 %v3055_v57, %v1597_v10  ;;  %v2328_v12 = vpop.f32.mrb[70].mxu1 }
 0x559   :  { %v1609_v13 = vadd.f32 %v2328_v12, %v3055_v57  ;;  %v1600_v28 = vpop.f32.mrb[71].mxu1  ;;  %v1714_v15 = vmax.f32 %v1606_v18, 0.0  ;;  %v1767_v18 = vsel %vm102_vm0, %v3063_v8, 0 }
 0x55a   :  { %v1601_v14 = vadd.f32 %v3055_v57, %v1600_v28  ;;  %v1712_v17 = vmax.f32 %v1598_v11, 0.0 }
 0x55b   :  { %v1715_v16 = vmax.f32 %v1609_v13, 0.0 }
 0x55c   :  { %v1713_v19 = vmax.f32 %v1601_v14, 0.0 }
 0x55d   :  { %v3069_v20 = vpack.c.bf16 %v1715_v16, %v1714_v15 }
 0x55e   :  { %v3071_v21 = vpack.c.bf16 %v1713_v19, %v1712_v17  ;;  %v2331_v22 = vpop.f32.mrb[72].mxu1 }
 0x55f   :  { %v1622_v23 = vadd.f32 %v2331_v22, %v3055_v57  ;;  %v1613_v24 = vpop.f32.mrb[73].mxu1 }
 0x560   :  { %v1614_v25 = vadd.f32 %v3055_v57, %v1613_v24  ;;  %v2332_v40 = vpop.f32.mrb[74].mxu1 }
 0x561   :  { %v1625_v26 = vadd.f32 %v2332_v40, %v3055_v57  ;;  %v1616_v27 = vpop.f32.mrb[75].mxu1  ;;  %v1718_v30 = vmax.f32 %v1622_v23, 0.0 }
 0x562   :  { %v1617_v29 = vadd.f32 %v3055_v57, %v1616_v27  ;;  %v1716_v32 = vmax.f32 %v1614_v25, 0.0  ;;  %v1770_v25 = vsel %vm102_vm0, %v3061_v7, 0 }
 0x563   :  { %v1719_v31 = vmax.f32 %v1625_v26, 0.0 }
 0x564   :  { %v1717_v33 = vmax.f32 %v1617_v29, 0.0 }
 0x565   :  { %v3077_v34 = vpack.c.bf16 %v1719_v31, %v1718_v30 }
 0x566   :  { %v3079_v35 = vpack.c.bf16 %v1717_v33, %v1716_v32  ;;  %v2335_v36 = vpop.f32.mrb[76].mxu1 }
 0x567   :  { %v1638_v37 = vadd.f32 %v2335_v36, %v3055_v57  ;;  %v1629_v53 = vpop.f32.mrb[77].mxu1 }
 0x568   :  { %v1630_v38 = vadd.f32 %v3055_v57, %v1629_v53  ;;  %v2336_v39 = vpop.f32.mrb[78].mxu1 }
 0x569   :  { %v1641_v41 = vadd.f32 %v2336_v39, %v3055_v57  ;;  %v1632_v42 = vpop.f32.mrb[79].mxu1  ;;  %v1722_v44 = vmax.f32 %v1638_v37, 0.0 }
 0x56a   :  { %v1633_v43 = vadd.f32 %v3055_v57, %v1632_v42  ;;  %v1720_v46 = vmax.f32 %v1630_v38, 0.0 }
 0x56b   :  { %v1723_v45 = vmax.f32 %v1641_v41, 0.0  ;;  %v1773_v41 = vsel %vm102_vm0, %v3071_v21, 0  ;;  %v1779_v21 = vsel %vm102_vm0, %v3079_v35, 0  ;;  %v1761_v35 = vpop.permute.xlu0 %1760 }
 0x56c   :  { %v1721_v47 = vmax.f32 %v1633_v43, 0.0 }
 0x56d   :  { %v3085_v48 = vpack.c.bf16 %v1723_v45, %v1722_v44 }
 0x56e   :  { %v3087_v49 = vpack.c.bf16 %v1721_v47, %v1720_v46  ;;  %v2339_v50 = vpop.f32.mrb[80].mxu1 }
 0x56f   :  { %v1654_v51 = vadd.f32 %v2339_v50, %v3055_v57  ;;  %v1645_v52 = vpop.f32.mrb[81].mxu1 }
 0x570   :  { %v1646_v54 = vadd.f32 %v3055_v57, %v1645_v52  ;;  %v2340_v5 = vpop.f32.mrb[82].mxu1 }
 0x571   :  { %v1657_v56 = vadd.f32 %v2340_v5, %v3055_v57  ;;  %v1648_v58 = vpop.f32.mrb[83].mxu1  ;;  %v1726_v60 = vmax.f32 %v1654_v51, 0.0  ;;  %v1785_v5 = vsel %vm102_vm0, %v3087_v49, 0 }
 0x572   :  { %v1649_v59 = vadd.f32 %v3055_v57, %v1648_v58  ;;  %v1724_v62 = vmax.f32 %v1646_v54, 0.0  ;;  %v1776_v54 = vsel %vm102_vm0, %v3069_v20, 0  ;;  %v1788_v20 = vsel %vm102_vm0, %v3085_v48, 0 }
 0x573   :  { %v1727_v61 = vmax.f32 %v1657_v56, 0.0  ;;  %v2578_v48 = vmov 1966171168  }
 0x574   :  { %v1725_v63 = vmax.f32 %v1649_v59, 0.0 }
 0x575   :  { %v1749_v0 = vpack.c.bf16 %v1727_v61, %v1726_v60 }
 0x576   :  { %v1748_v1 = vpack.c.bf16 %v1725_v63, %v1724_v62  ;;  %v2343_v2 = vpop.f32.mrb[84].mxu1 }
 0x577   :  { %v1670_v3 = vadd.f32 %v2343_v2, %v3055_v57  ;;  %v1661_v4 = vpop.f32.mrb[85].mxu1 }
 0x578   :  { %v1662_v6 = vadd.f32 %v3055_v57, %v1661_v4  ;;  %v2344_v9 = vpop.f32.mrb[86].mxu1  ;;  %2354 = vmatprep.subr.msk.bf16.mxu0 %vm102_vm0, %v1748_v1 }
 0x579   :  { %v1673_v10 = vadd.f32 %v2344_v9, %v3055_v57  ;;  %v1664_v11 = vpop.f32.mrb[87].mxu1  ;;  %2120 = vmatpush3.bf16.xpose.msra.mxu0 %v1767_v18  ;;  %v1730_v13 = vmax.f32 %v1670_v3, 0.0  ;;  %v1871_v3 = vunpack.c.l.s4 %v2578_v48 }
 0x57a   :  { %v1665_v12 = vadd.f32 %v3055_v57, %v1664_v11  ;;  %2355 = vmatprep.subr.msk.bf16.mxu0 %vm102_vm0, %v1749_v0  ;;  %v1728_v14 = vmax.f32 %v1662_v6, 0.0 }
 0x57b   :  { %v1731_v28 = vmax.f32 %v1673_v10, 0.0  ;;  %v1872_v4 = vunpack.c.0.s8 %v1871_v3 }
 0x57c   :  { %v1729_v15 = vmax.f32 %v1665_v12, 0.0 }
 0x57d   :  { %v1751_v16 = vpack.c.bf16 %v1731_v28, %v1730_v13 }
 0x57e   :  { %v1750_v17 = vpack.c.bf16 %v1729_v15, %v1728_v14  ;;  %v2347_v19 = vpop.f32.mrb[88].mxu1 }
 0x57f   :  { %v1686_v22 = vadd.f32 %v2347_v19, %v3055_v57  ;;  %v1677_v23 = vpop.f32.mrb[89].mxu1 }
 0x580   :  { %v1678_v8 = vadd.f32 %v3055_v57, %v1677_v23  ;;  %v2348_v24 = vpop.f32.mrb[90].mxu1 }
 0x581   :  { %v1689_v40 = vadd.f32 %v2348_v24, %v3055_v57  ;;  %v1680_v26 = vpop.f32.mrb[91].mxu1  ;;  %2122 = vmatpush3.bf16.xpose.msra.mxu0 %v1770_v25  ;;  %v1734_v29 = vmax.f32 %v1686_v22, 0.0 }
 0x582   :  { %v1681_v27 = vadd.f32 %v3055_v57, %v1680_v26  ;;  %2356 = vmatprep.subr.msk.bf16.mxu0 %vm102_vm0, %v1750_v17  ;;  %v1732_v31 = vmax.f32 %v1678_v8, 0.0 }
 0x583   :  { %v1735_v30 = vmax.f32 %v1689_v40, 0.0 }
 0x584   :  { %v1733_v32 = vmax.f32 %v1681_v27, 0.0 }
 0x585   :  { %v1753_v33 = vpack.c.bf16 %v1735_v30, %v1734_v29 }
 0x586   :  { %v1752_v36 = vpack.c.bf16 %v1733_v32, %v1732_v31  ;;  %v2351_v37 = vpop.f32.mrb[92].mxu1 }
 0x587   :  { %v1702_v53 = vadd.f32 %v2351_v37, %v3055_v57  ;;  %v1693_v38 = vpop.f32.mrb[93].mxu1 }
 0x588   :  { %v1694_v7 = vadd.f32 %v3055_v57, %v1693_v38  ;;  %v2352_v39 = vpop.f32.mrb[94].mxu1 }
 0x589   :  { %v1738_v42 = vmax.f32 %v1702_v53, 0.0  ;;  %v1705_v43 = vadd.f32 %v2352_v39, %v3055_v57  ;;  %2124 = vmatpush3.bf16.xpose.msra.mxu0 %v1773_v41  ;;  %v1696_v44 = vpop.f32.mrb[95].mxu1 }
 0x58a   :  { %v1736_v45 = vmax.f32 %v1694_v7, 0.0  ;;  %v1697_v46 = vadd.f32 %v3055_v57, %v1696_v44  ;;  %2357 = vmatprep.subr.msk.bf16.mxu0 %vm102_vm0, %v1751_v16  ;;  %v1782_v57 = vsel %vm102_vm0, %v3077_v34, 0 }
 0x58b   :  { %v1739_v47 = vmax.f32 %v1705_v43, 0.0 }
 0x58c   :  { %v1737_v50 = vmax.f32 %v1697_v46, 0.0 }
 0x58d   :  { %v1755_v51 = vpack.c.bf16 %v1739_v47, %v1738_v42 }
 0x58e   :  { %v1754_v52 = vpack.c.bf16 %v1737_v50, %v1736_v45 }
 0x591   :  { %2126 = vmatpush3.bf16.xpose.msra.mxu0 %v1776_v54 }
 0x592   :  { %2358 = vmatprep.subr.msk.bf16.mxu0 %vm102_vm0, %v1752_v36 }
 0x599   :  { %2128 = vmatpush3.bf16.xpose.msra.mxu0 %v1779_v21 }
 0x59a   :  { %2359 = vmatprep.subr.msk.bf16.mxu0 %vm102_vm0, %v1753_v33 }
 0x5a1   :  { %2130 = vmatpush3.bf16.xpose.msra.mxu0 %v1782_v57 }
 0x5a2   :  { %2360 = vmatprep.subr.msk.bf16.mxu0 %vm102_vm0, %v1754_v52 }
 0x5a9   :  { %2132 = vmatpush3.bf16.xpose.msra.mxu0 %v1785_v5 }
 0x5aa   :  { %2361 = vmatprep.subr.msk.bf16.mxu0 %vm102_vm0, %v1755_v51 }
 0x5b1   :  { %2134 = vmatpush3.bf16.xpose.msra.mxu0 %v1788_v20 }
 0x5b8   :  { %2136 = vmatmul.mubr.msk.bf16.vlgmr.msra.gmra.mrb[96].mxu0 %vm102_vm0, %v3045_v55  ;;  %v1873_v55 = vlaneseq }
 0x5ba   :  { %v1874_v6 = vshrl.u32 %v1873_v55, 7  ;;  %vm1887_vm5 = vcmp.lt.s32.totalorder %v1873_v55, 256 }
 0x5bc   :  { %v1875_v18 = vsub.s32 %v1872_v4, %v1874_v6 }
 0x68b   :  { %v1848_v56 = vpop.f32.mrb[96].mxu0 }
 0x68c   :  { %v1849_v58 = vadd.f32 %v1848_v56, %v1761_v35  ;;  %v1850_v34 = vpop.f32.mrb[97].mxu0 }
 0x68d   :  { %v1851_v59 = vadd.f32 %v1850_v34, %v1761_v35  ;;  %v1852_v60 = vpop.f32.mrb[98].mxu0 }
 0x68e   :  { %v2009_v61 = vmul.f32 -1.442695, %v1849_v58  ;;  %v1853_v62 = vpop.f32.mrb[99].mxu0 }
 0x68f   :  { %v2010_v63 = vmul.f32 -1.442695, %v1851_v59 }
 0x690   :  { %2569 = vpow2.f32 %v2009_v61 }
 0x691   :  { %2571 = vpow2.f32 %v2010_v63 }
 0x69a   :  { %v2570_v49 = vpop.eup %2569 }
 0x69b   :  { %v2572_v0 = vpop.eup %2571  ;;  %v1861_v1 = vadd.f32 1.0, %v2570_v49 }
 0x69c   :  { %v1862_v2 = vadd.f32 1.0, %v2572_v0 }
 0x69d   :  { %2573 = vrcp.f32 %v1861_v1 }
 0x69e   :  { %2575 = vrcp.f32 %v1862_v2 }
 0x6a7   :  { %v2574_v9 = vpop.eup %2573 }
 0x6a8   :  { %v2576_v10 = vpop.eup %2575 }
 0x6a9   :  { %v1869_v11 = vcombine.low %v2574_v9, %v2576_v10 }
 0x6ab   :  { %v1876_v12 = vrot.slane %v1869_v11, %v1875_v18 }
 0x6ad   :  { %v1883_v13 = vrot.slane %v1876_v12, %v1875_v18 }
 0x6af   :  { %1889 = vst.msk [vmem:[%s3143_s9] sm:$0x3] %vm1887_vm5, %v1883_v13 }

</bundles_post_ra>
